<compile_context>
chip_gen: v5e
topology: v5e:2x2
jax: 0.10.0
libtpu: 0.0.40
codegen_flags: <defaults>
</compile_context>

<pallas_src>
import functools

import numpy as np
import jax
import jax.numpy as jnp
from jax.experimental import pallas as pl
from jax.experimental.pallas import tpu as pltpu

AMIN = 1e-10          # AmplitudeToDB amin
DB_MULT = 10.0        # power spectrogram -> dB multiplier (stype="power")
LN10 = float(np.log(10.0))


def _cdiv(a, b):
    return -(-a // b)


def _round_up(x, m):
    return _cdiv(x, m) * m


def _hann_window(n_fft):
    # torch.hann_window default (periodic=True)
    k = np.arange(n_fft, dtype=np.float64)
    return 0.5 - 0.5 * np.cos(2.0 * np.pi * k / n_fft)


def _mel_filterbank(n_freqs, f_min, f_max, n_mels, sample_rate):
    """torchaudio.functional.melscale_fbanks (mel_scale='htk', norm=None), float64."""
    all_freqs = np.linspace(0.0, sample_rate // 2, n_freqs)
    hz_to_mel = lambda f: 2595.0 * np.log10(1.0 + f / 700.0)
    mel_to_hz = lambda m: 700.0 * (10.0 ** (m / 2595.0) - 1.0)
    m_pts = np.linspace(hz_to_mel(f_min), hz_to_mel(f_max), n_mels + 2)
    f_pts = mel_to_hz(m_pts)
    f_diff = f_pts[1:] - f_pts[:-1]
    slopes = f_pts[None, :] - all_freqs[:, None]          # (n_freqs, n_mels + 2)
    down = -slopes[:, :-2] / f_diff[:-1]
    up = slopes[:, 2:] / f_diff[1:]
    return np.maximum(0.0, np.minimum(down, up))          # (n_freqs, n_mels)


def _logmel_kernel(slab_ref, cw_ref, sw_ref, fb_ref, o_ref, *,
                   frames_per_tile, chunks_per_frame, hop_length, compute_dtype):
    """One tile = T frames of one batch row.

    slab_ref: (1, 1, slab_rows, hop)  hop-sized chunks covering this tile's T frames
    cw_ref:   (n_fft, F_pad)          Hann-windowed cos-DFT matrix (Nyquist trimmed, lane padded)
    sw_ref:   (n_fft, F_pad)          Hann-windowed sin-DFT matrix
    fb_ref:   (F_pad, M_pad)          mel filterbank (zero-padded rows/lanes)
    o_ref:    (1, M_pad, T)           transposed log-mel (dB) output tile
    """
    T = frames_per_tile
    R = chunks_per_frame
    hop = hop_length
    F_pad = cw_ref.shape[1]

    slab = slab_ref[0, 0].astype(compute_dtype)            # (slab_rows, hop)

    # Windowed real DFT without materializing the (T, n_fft) frames matrix:
    #   frame q = [chunk q, ..., chunk q+R-1]  =>  re += slab[r:r+T] @ cw[r*hop:(r+1)*hop]
    re = jnp.zeros((T, F_pad), jnp.float32)
    im = jnp.zeros((T, F_pad), jnp.float32)
    for r in range(R):                                     # R is small & static -> unrolled
        blk = slab[r:r + T, :]                             # (T, hop) sublane-offset slice
        re += jnp.dot(blk, cw_ref[r * hop:(r + 1) * hop, :],
                      preferred_element_type=jnp.float32)
        im += jnp.dot(blk, sw_ref[r * hop:(r + 1) * hop, :],
                      preferred_element_type=jnp.float32)

    power = re * re + im * im                              # |STFT|^2    (T, F_pad) f32
    mel = jnp.dot(power, fb_ref[...], preferred_element_type=jnp.float32)

    # AmplitudeToDB (stype="power", ref=1.0 -> db_multiplier=0; top_db handled in wrapper).
    logmel = (DB_MULT / LN10) * jnp.log(jnp.maximum(mel, AMIN))

    # Lane-dense transposed store -> output already in (mel, frame) layout.
    o_ref[0] = logmel.T.astype(o_ref.dtype)                # (M_pad, T)


def logmel_extractor_forward(x, *, sample_rate, n_fft, hop_length, n_mels,
                             top_db=None, frames_per_tile=128, use_bf16_matmul=False):
    """x: (batch, num_samples) waveform -> (batch, n_mels, n_frames) log-mel in dB."""
    assert x.ndim == 2
    assert n_fft % hop_length == 0, "kernel framing requires hop_length | n_fft"
    T = frames_per_tile
    assert T >= 128 and T % 128 == 0, "frames_per_tile must be a positive multiple of 128"

    B, num_samples = x.shape
    hop = hop_length
    R = n_fft // hop
    pad = n_fft // 2
    n_frames = 1 + num_samples // hop
    n_freqs = n_fft // 2 + 1
    n_tiles = _cdiv(n_frames, T)
    n_frames_pad = n_tiles * T
    slab_rows = _round_up(T + R - 1, 8)                    # sublane-aligned slab height
    n_chunks = (n_tiles - 1) * T + slab_rows               # chunks needed to cover all slabs
    total_len = n_chunks * hop

    # center=True reflect padding, then hop-sized chunks, then per-tile slabs (T + R - 1 chunks
    # each, ~2% duplication) so per-step VMEM is bounded and independent of audio length.
    xp = jnp.pad(x.astype(jnp.float32), ((0, 0), (pad, pad)), mode="reflect")
    if xp.shape[1] > total_len:
        xp = xp[:, :total_len]                             # trailing samples feed no real frame
    xp = jnp.pad(xp, ((0, 0), (0, total_len - xp.shape[1])))
    chunks = xp.reshape(B, n_chunks, hop)
    slab_idx = np.arange(n_tiles)[:, None] * T + np.arange(slab_rows)[None, :]
    slabs = chunks[:, slab_idx, :]                         # (B, n_tiles, slab_rows, hop)

    # Mel filterbank; trim trailing all-zero frequency rows (with f_max = sr/2 the Nyquist row
    # is exactly zero) so the DFT/mel matmuls don't pay for a 129 -> 256 lane round-up.
    fb_full = _mel_filterbank(n_freqs, 0.0, float(sample_rate // 2), n_mels, sample_rate)
    F_used = n_freqs
    while F_used > 1 and float(np.max(np.abs(fb_full[F_used - 1]))) < 1e-10:
        F_used -= 1
    F_pad = _round_up(F_used, 128)                         # lane-dense freq axis
    M_pad = _round_up(n_mels, 128)                         # lane-dense mel axis

    # Windowed DFT matrices (float64 construction, exact phase via integer mod reduction).
    k = np.arange(n_fft)
    f = np.arange(F_used)
    phase = 2.0 * np.pi * ((k[:, None] * f[None, :]) % n_fft) / n_fft
    win = _hann_window(n_fft)[:, None]
    cw = np.zeros((n_fft, F_pad), np.float32)
    sw = np.zeros((n_fft, F_pad), np.float32)
    cw[:, :F_used] = win * np.cos(phase)
    sw[:, :F_used] = win * np.sin(phase)
    fb = np.zeros((F_pad, M_pad), np.float32)
    fb[:F_used, :n_mels] = fb_full[:F_used]

    compute_dtype = jnp.bfloat16 if use_bf16_matmul else jnp.float32
    cw_j = jnp.asarray(cw).astype(compute_dtype)
    sw_j = jnp.asarray(sw).astype(compute_dtype)
    fb_j = jnp.asarray(fb)                                 # mel projection stays f32 for dB accuracy

    kernel = functools.partial(_logmel_kernel, frames_per_tile=T, chunks_per_frame=R,
                               hop_length=hop, compute_dtype=compute_dtype)

    # VMEM footprint (double-buffered blocks + live f32 intermediates) and cost hints.
    const_elem = 2 if use_bf16_matmul else 4
    vmem_est = (2 * (slab_rows * hop * 4 + 2 * n_fft * F_pad * const_elem
                     + F_pad * M_pad * 4 + M_pad * T * 4)
                + 4 * T * (3 * F_pad + 2 * M_pad))
    vmem_limit = int(max(32 << 20, min(48 << 20, 2 * vmem_est)))
    flops = int(B * n_frames_pad * (4 * n_fft * F_pad + 2 * F_pad * M_pad))
    bytes_accessed = int(4 * slabs.size + 2 * const_elem * n_fft * F_pad
                         + 4 * F_pad * M_pad + 4 * B * M_pad * n_frames_pad)

    out = pl.pallas_call(
        kernel,
        out_shape=jax.ShapeDtypeStruct((B, M_pad, n_frames_pad), jnp.float32),
        grid=(B, n_tiles),
        in_specs=[
            pl.BlockSpec((1, 1, slab_rows, hop), lambda b, t: (b, t, 0, 0)),
            pl.BlockSpec((n_fft, F_pad), lambda b, t: (0, 0)),
            pl.BlockSpec((n_fft, F_pad), lambda b, t: (0, 0)),
            pl.BlockSpec((F_pad, M_pad), lambda b, t: (0, 0)),
        ],
        out_specs=pl.BlockSpec((1, M_pad, T), lambda b, t: (b, 0, t)),
        compiler_params=pltpu.CompilerParams(
            dimension_semantics=("parallel", "parallel"),
            vmem_limit_bytes=vmem_limit),
        cost_estimate=pl.CostEstimate(flops=flops,
                                      transcendentals=int(B * n_frames_pad * M_pad),
                                      bytes_accessed=bytes_accessed),
    )(slabs, cw_j, sw_j, fb_j)

    logmel = out[:, :n_mels, :n_frames]                    # drop padded mel lanes / frames
    if top_db is not None:
        # torchaudio amplitude_to_DB clamps a 3-D (B, mel, time) tensor against its global max.
        logmel = jnp.maximum(logmel, jnp.max(logmel) - top_db)
    return logmel                                          # (B, n_mels, n_frames)


def _reference_logmel(x, *, sample_rate, n_fft, hop_length, n_mels, top_db=None):
    """Pure-JAX reference mirroring torchaudio MelSpectrogram + AmplitudeToDB."""
    pad = n_fft // 2
    xp = jnp.pad(x.astype(jnp.float32), ((0, 0), (pad, pad)), mode="reflect")
    n_frames = 1 + x.shape[1] // hop_length
    idx = np.arange(n_frames)[:, None] * hop_length + np.arange(n_fft)[None, :]
    frames = xp[:, idx]                                    # (B, n_frames, n_fft)
    window = jnp.asarray(_hann_window(n_fft), jnp.float32)
    spec = jnp.fft.rfft(frames * window[None, None, :], n=n_fft, axis=-1)
    power = jnp.real(spec) ** 2 + jnp.imag(spec) ** 2
    n_freqs = n_fft // 2 + 1
    fb = jnp.asarray(_mel_filterbank(n_freqs, 0.0, float(sample_rate // 2),
                                     n_mels, sample_rate), jnp.float32)
    mel = power @ fb                                       # (B, n_frames, n_mels)
    db = 10.0 * jnp.log10(jnp.maximum(mel, AMIN))
    db = jnp.transpose(db, (0, 2, 1))                      # (B, n_mels, n_frames)
    if top_db is not None:
        db = jnp.maximum(db, jnp.max(db) - top_db)
    return db


if __name__ == "__main__":
    key = jax.random.PRNGKey(0)
    B = 2
    sample_rate, n_fft, hop_length, n_mels = 16000, 256, 64, 64
    num_samples = 2048

    x = jax.random.normal(key, (B, num_samples), dtype=jnp.float32)

    out = logmel_extractor_forward(x, sample_rate=sample_rate, n_fft=n_fft,
                                   hop_length=hop_length, n_mels=n_mels,
                                   top_db=None, frames_per_tile=128)
    out = jax.block_until_ready(out)

    ref = jax.block_until_ready(_reference_logmel(x, sample_rate=sample_rate,
                                                  n_fft=n_fft, hop_length=hop_length,
                                                  n_mels=n_mels))
    n_frames = 1 + num_samples // hop_length
    assert out.shape == (B, n_mels, n_frames), out.shape
    err = float(jnp.max(jnp.abs(out - ref)))
    assert err < 5e-3, err
    print("KERNEL_OK")
</pallas_src>

<mosaic_0001>
module attributes {stable_mosaic.version = 11 : i64} {
  func.func @_logmel_kernel(%arg0: i32, %arg1: i32, %arg2: memref<1x1x136x64xf32, #tpu.memory_space<vmem>>, %arg3: memref<256x128xf32, #tpu.memory_space<vmem>>, %arg4: memref<256x128xf32, #tpu.memory_space<vmem>>, %arg5: memref<128x128xf32, #tpu.memory_space<vmem>>, %arg6: memref<1x128x128xf32, #tpu.memory_space<vmem>>) attributes {dimension_semantics = [#tpu.dimension_semantics<parallel>, #tpu.dimension_semantics<parallel>], iteration_bounds = array<i64: 2, 1>, scalar_prefetch = 0 : i64, scratch_operands = 0 : i64, tpu.core_type = #tpu.core_type<tc>, window_params = [{transform_indices = @transform_0, window_bounds = array<i64: 1, 1, 136, 64>}, {pipeline_mode = #tpu.pipeline_mode<synchronous>, transform_indices = @transform_1, window_bounds = array<i64: 256, 128>}, {pipeline_mode = #tpu.pipeline_mode<synchronous>, transform_indices = @transform_2, window_bounds = array<i64: 256, 128>}, {pipeline_mode = #tpu.pipeline_mode<synchronous>, transform_indices = @transform_3, window_bounds = array<i64: 128, 128>}, {transform_indices = @transform_4, window_bounds = array<i64: 1, 128, 128>}]} {
    %c0 = arith.constant 0 : index
    %c0_0 = arith.constant 0 : index
    %c0_1 = arith.constant 0 : index
    %c0_2 = arith.constant 0 : index
    %0 = vector.load %arg2[%c0, %c0_0, %c0_1, %c0_2] : memref<1x1x136x64xf32, #tpu.memory_space<vmem>>, vector<1x1x136x64xf32>
    %1 = vector.shape_cast %0 : vector<1x1x136x64xf32> to vector<136x64xf32>
    %cst = arith.constant 0.000000e+00 : f32
    %2 = vector.broadcast %cst : f32 to vector<128x128xf32>
    %cst_3 = arith.constant 0.000000e+00 : f32
    %3 = vector.broadcast %cst_3 : f32 to vector<128x128xf32>
    %4 = vector.extract_strided_slice %1 {offsets = [0, 0], sizes = [128, 64], strides = [1, 1]} : vector<136x64xf32> to vector<128x64xf32>
    %c0_4 = arith.constant 0 : index
    %c0_5 = arith.constant 0 : index
    %5 = vector.load %arg3[%c0_4, %c0_5] : memref<256x128xf32, #tpu.memory_space<vmem>>, vector<64x128xf32>
    %cst_6 = arith.constant dense<0.000000e+00> : vector<128x128xf32>
    %6 = tpu.matmul %4, %5, %cst_6 {dimension_numbers = #tpu.dot_dimension_numbers<[1], [0], [0], [1], [0, 0, 1, 1], [], []>} : vector<128x64xf32>, vector<64x128xf32>, vector<128x128xf32> -> vector<128x128xf32>
    %7 = arith.addf %2, %6 : vector<128x128xf32>
    %c0_7 = arith.constant 0 : index
    %c0_8 = arith.constant 0 : index
    %8 = vector.load %arg4[%c0_7, %c0_8] : memref<256x128xf32, #tpu.memory_space<vmem>>, vector<64x128xf32>
    %cst_9 = arith.constant dense<0.000000e+00> : vector<128x128xf32>
    %9 = tpu.matmul %4, %8, %cst_9 {dimension_numbers = #tpu.dot_dimension_numbers<[1], [0], [0], [1], [0, 0, 1, 1], [], []>} : vector<128x64xf32>, vector<64x128xf32>, vector<128x128xf32> -> vector<128x128xf32>
    %10 = arith.addf %3, %9 : vector<128x128xf32>
    %11 = vector.extract_strided_slice %1 {offsets = [1, 0], sizes = [128, 64], strides = [1, 1]} : vector<136x64xf32> to vector<128x64xf32>
    %c64 = arith.constant 64 : index
    %c0_10 = arith.constant 0 : index
    %12 = vector.load %arg3[%c64, %c0_10] : memref<256x128xf32, #tpu.memory_space<vmem>>, vector<64x128xf32>
    %cst_11 = arith.constant dense<0.000000e+00> : vector<128x128xf32>
    %13 = tpu.matmul %11, %12, %cst_11 {dimension_numbers = #tpu.dot_dimension_numbers<[1], [0], [0], [1], [0, 0, 1, 1], [], []>} : vector<128x64xf32>, vector<64x128xf32>, vector<128x128xf32> -> vector<128x128xf32>
    %14 = arith.addf %7, %13 : vector<128x128xf32>
    %c64_12 = arith.constant 64 : index
    %c0_13 = arith.constant 0 : index
    %15 = vector.load %arg4[%c64_12, %c0_13] : memref<256x128xf32, #tpu.memory_space<vmem>>, vector<64x128xf32>
    %cst_14 = arith.constant dense<0.000000e+00> : vector<128x128xf32>
    %16 = tpu.matmul %11, %15, %cst_14 {dimension_numbers = #tpu.dot_dimension_numbers<[1], [0], [0], [1], [0, 0, 1, 1], [], []>} : vector<128x64xf32>, vector<64x128xf32>, vector<128x128xf32> -> vector<128x128xf32>
    %17 = arith.addf %10, %16 : vector<128x128xf32>
    %18 = vector.extract_strided_slice %1 {offsets = [2, 0], sizes = [128, 64], strides = [1, 1]} : vector<136x64xf32> to vector<128x64xf32>
    %c128 = arith.constant 128 : index
    %c0_15 = arith.constant 0 : index
    %19 = vector.load %arg3[%c128, %c0_15] : memref<256x128xf32, #tpu.memory_space<vmem>>, vector<64x128xf32>
    %cst_16 = arith.constant dense<0.000000e+00> : vector<128x128xf32>
    %20 = tpu.matmul %18, %19, %cst_16 {dimension_numbers = #tpu.dot_dimension_numbers<[1], [0], [0], [1], [0, 0, 1, 1], [], []>} : vector<128x64xf32>, vector<64x128xf32>, vector<128x128xf32> -> vector<128x128xf32>
    %21 = arith.addf %14, %20 : vector<128x128xf32>
    %c128_17 = arith.constant 128 : index
    %c0_18 = arith.constant 0 : index
    %22 = vector.load %arg4[%c128_17, %c0_18] : memref<256x128xf32, #tpu.memory_space<vmem>>, vector<64x128xf32>
    %cst_19 = arith.constant dense<0.000000e+00> : vector<128x128xf32>
    %23 = tpu.matmul %18, %22, %cst_19 {dimension_numbers = #tpu.dot_dimension_numbers<[1], [0], [0], [1], [0, 0, 1, 1], [], []>} : vector<128x64xf32>, vector<64x128xf32>, vector<128x128xf32> -> vector<128x128xf32>
    %24 = arith.addf %17, %23 : vector<128x128xf32>
    %25 = vector.extract_strided_slice %1 {offsets = [3, 0], sizes = [128, 64], strides = [1, 1]} : vector<136x64xf32> to vector<128x64xf32>
    %c192 = arith.constant 192 : index
    %c0_20 = arith.constant 0 : index
    %26 = vector.load %arg3[%c192, %c0_20] : memref<256x128xf32, #tpu.memory_space<vmem>>, vector<64x128xf32>
    %cst_21 = arith.constant dense<0.000000e+00> : vector<128x128xf32>
    %27 = tpu.matmul %25, %26, %cst_21 {dimension_numbers = #tpu.dot_dimension_numbers<[1], [0], [0], [1], [0, 0, 1, 1], [], []>} : vector<128x64xf32>, vector<64x128xf32>, vector<128x128xf32> -> vector<128x128xf32>
    %28 = arith.addf %21, %27 : vector<128x128xf32>
    %c192_22 = arith.constant 192 : index
    %c0_23 = arith.constant 0 : index
    %29 = vector.load %arg4[%c192_22, %c0_23] : memref<256x128xf32, #tpu.memory_space<vmem>>, vector<64x128xf32>
    %cst_24 = arith.constant dense<0.000000e+00> : vector<128x128xf32>
    %30 = tpu.matmul %25, %29, %cst_24 {dimension_numbers = #tpu.dot_dimension_numbers<[1], [0], [0], [1], [0, 0, 1, 1], [], []>} : vector<128x64xf32>, vector<64x128xf32>, vector<128x128xf32> -> vector<128x128xf32>
    %31 = arith.addf %24, %30 : vector<128x128xf32>
    %32 = arith.mulf %28, %28 : vector<128x128xf32>
    %33 = arith.mulf %31, %31 : vector<128x128xf32>
    %34 = arith.addf %32, %33 : vector<128x128xf32>
    %c0_25 = arith.constant 0 : index
    %c0_26 = arith.constant 0 : index
    %35 = vector.load %arg5[%c0_25, %c0_26] : memref<128x128xf32, #tpu.memory_space<vmem>>, vector<128x128xf32>
    %cst_27 = arith.constant dense<0.000000e+00> : vector<128x128xf32>
    %36 = tpu.matmul %34, %35, %cst_27 {dimension_numbers = #tpu.dot_dimension_numbers<[1], [0], [0], [1], [0, 0, 1, 1], [], []>} : vector<128x128xf32>, vector<128x128xf32>, vector<128x128xf32> -> vector<128x128xf32>
    %cst_28 = arith.constant 1.000000e-10 : f32
    %37 = vector.broadcast %cst_28 : f32 to vector<128x128xf32>
    %38 = arith.maximumf %36, %37 : vector<128x128xf32>
    %39 = math.log %38 : vector<128x128xf32>
    %cst_29 = arith.constant 4.34294462 : f32
    %40 = vector.broadcast %cst_29 : f32 to vector<128x128xf32>
    %41 = arith.mulf %40, %39 : vector<128x128xf32>
    %42 = tpu.transpose %41, [1, 0] : vector<128x128xf32> -> vector<128x128xf32>
    %c0_30 = arith.constant 0 : index
    %c0_31 = arith.constant 0 : index
    %c0_32 = arith.constant 0 : index
    %43 = vector.load %arg6[%c0_30, %c0_31, %c0_32] : memref<1x128x128xf32, #tpu.memory_space<vmem>>, vector<1x128x128xf32>
    %44 = vector.shape_cast %43 : vector<1x128x128xf32> to vector<128x128xf32>
    %45 = vector.shape_cast %42 : vector<128x128xf32> to vector<1x128x128xf32>
    tpu.vector_store %arg6[%c0_30, %c0_31, %c0_32], %45 {strides = array<i32>} : memref<1x128x128xf32, #tpu.memory_space<vmem>>, vector<1x128x128xf32>,
    return
  }
  func.func @transform_0(%arg0: i32, %arg1: i32) -> (i32, i32, i32, i32) {
    %c0_i32 = arith.constant 0 : i32
    %c0_i32_0 = arith.constant 0 : i32
    %c0_i32_1 = arith.constant 0 : i32
    return %arg0, %arg1, %c0_i32, %c0_i32_0 : i32, i32, i32, i32
  }
  func.func @transform_1(%arg0: i32, %arg1: i32) -> (i32, i32) {
    %c0_i32 = arith.constant 0 : i32
    %c0_i32_0 = arith.constant 0 : i32
    %c0_i32_1 = arith.constant 0 : i32
    return %c0_i32, %c0_i32_0 : i32, i32
  }
  func.func @transform_2(%arg0: i32, %arg1: i32) -> (i32, i32) {
    %c0_i32 = arith.constant 0 : i32
    %c0_i32_0 = arith.constant 0 : i32
    %c0_i32_1 = arith.constant 0 : i32
    return %c0_i32, %c0_i32_0 : i32, i32
  }
  func.func @transform_3(%arg0: i32, %arg1: i32) -> (i32, i32) {
    %c0_i32 = arith.constant 0 : i32
    %c0_i32_0 = arith.constant 0 : i32
    %c0_i32_1 = arith.constant 0 : i32
    return %c0_i32, %c0_i32_0 : i32, i32
  }
  func.func @transform_4(%arg0: i32, %arg1: i32) -> (i32, i32, i32) {
    %c0_i32 = arith.constant 0 : i32
    %c0_i32_0 = arith.constant 0 : i32
    return %arg0, %c0_i32, %arg1 : i32, i32, i32
  }
}

</mosaic_0001>

<bundles_post_ra>
// kernel: tpu_custom_call.1
= control target key start
LH: loop header
LB: loop body
LE: loop exit
PB: predicated region body
PF: predicated region fallthrough
CT: control target
= control target key end

     0   :  { %9 = vsyncpa [#allocation3], 0  ;;  %s2822_s0 = inlined_call_operand.vmem [shape: f32[2,1,136,64], index: 0, kind: input, shape index: {}]   ;;  %s2823_s1 = inlined_call_operand.vmem [shape: f32[256,128], index: 1, kind: input, shape index: {}]   ;;  %s2824_s2 = inlined_call_operand.vmem [shape: f32[256,128], index: 2, kind: input, shape index: {}]   ;;  %s2825_s3 = inlined_call_operand.hbm [shape: f32[128,128], index: 3, kind: input, shape index: {}]   ;;  %s2826_s4 = inlined_call_operand.hbm [shape: f32[2,128,128], index: 4, kind: output, shape index: {}]  }
   0x1   :  { %10 = vsyncpa [#allocation4], 0 }
   0x2   :  { %12 = vsyncpa [#allocation4 + $0x1], 0  ;;  %s1919_s15 = smov 0   ;;  %s1921_s16 = smov 0  }
   0x3   :  { %s1923_s17 = smov 0   ;;  %s1925_s18 = smov 0  }
   0x4   :  { %s1927_s19 = smov 0   ;;  %s1929_s20 = smov 0  }
   0x5 LB: > { %s1505_s21 = sadd.s32 4294967295, %s1887_s20   ;;  %s1506_s22 = sadd.s32 4294967294, %s1887_s20   ;;  %s1887_s20 = sphi %s1929_s20, %s18_s20   ;;  %s1883_s19 = sphi %s1927_s19, %s2841_s19   ;;  %s1879_s18 = sphi %s1925_s18, %s2840_s18   ;;  %s1875_s17 = sphi %s1923_s17, %s2839_s17   ;;  %s1871_s16 = sphi %s1921_s16, %s2838_s16   ;;  %s1867_s15 = sphi %s1919_s15, %s2837_s15  }
   0x6   : > { %s30_s23 = sadd.s32 1, %s1883_s19  ;;  %s130_s24 = sadd.s32 1, %s1875_s17 }
   0x7   : > { %p32_p0 = scmp.ge.s32.totalorder %s30_s23, 2  ;;  %p140_p1 = scmp.ne.s32.totalorder %s1875_s17, %s1871_s16 }
   0x8   : > { %p141_p2 = scmp.eq.s32.totalorder %s1505_s21, 1  ;;  %p146_p3 = scmp.ne.s32.totalorder %s1871_s16, %s1867_s15 }
   0x9   : > { %s2843_s23 = smov (%p32_p0, %s30_s23), 0  ;;  %p147_p5 = scmp.eq.s32.totalorder %s1506_s22, 1 }
   0xa   : > { %p1959_p4 = por %p141_p2, %p140_p1  ;;  %s125_s26 = ssub.s32 %s1883_s19, %s2843_s23 }
   0xb   : > { %p1507_p6 = scmp.ge.s32.totalorder %s1887_s20, 1  ;;  %p128_p7 = scmp.eq.s32.totalorder %s125_s26, 0 }
   0xc   : > { %p1966_p8 = por %p147_p5, %p146_p3  ;;  %p154_p9 = scmp.lt.s32.totalorder %s1887_s20, 3 }
   0xd   : > { %s1972_s28 = scalar_select %p128_p7, %s1875_s17, %s130_s24  }
   0xe   : > { %p155_p10 = pnand %p1507_p6, %p154_p9  ;;  %p1687_p11 = scmp.eq.s32.totalorder %s1505_s21, 0 }
   0xf   : > { %s171_s5 = sshll.u32 %s2825_s3, 4  ;;  %s1889_s6 = smov [#allocation2]   ;;  %s172_s5 = int_to_ptr.hbm [resolvable:$true] %s171_s5 }
  0x10   : > { %p1679_p12 = pneg %p155_p10  ;;  %s173_s7 = sshll.u32 %s1889_s6, 4  ;;  %s174_s7 = int_to_ptr.vmem [resolvable:$true] %s173_s7 }
  0x11   : > { %s1890_s8 = smov 128   ;;  %s1891_s9 = smov 8  }
  0x12   : > { %p1680_p13 = pnand %p1687_p11, %p1679_p12  ;;  %201 = sbr.rel (%p155_p10) target bundleno = 767 (0x2ff), region = 36 }
  0x14   : > { %1682 = dma.hbm_to_vmem [thread:$0]  (!%p1680_p13), %s172_s5, 2048, %s174_s7, [#allocation3], %s1890_s8, %s1890_s8, %s1891_s9  }
  0x17   : > { %1858 = dma.done.wait (%p1687_p11), [#allocation3], 2048  }
  0x18   : > { %1860 = vsyncadd (%p1687_p11), [#allocation3], 4294965248  ;;  %p232_p0 = scmp.lt.s32.totalorder %s1879_s18, 1  ;;  %v281_v0 = vld [vmem:[%s2823_s1 + $0x78] sm:$0xff]  ;;  %v280_v1 = vld [vmem:[%s2823_s1 + $0x70] sm:$0xff]  ;;  %vm299_vm0 = vcmask 1046528  }
  0x19   : > { %1648 = vmatpush.msra.mxu1 %v281_v0  ;;  %1649 = vmatpush.msra.mxu2 %v281_v0  ;;  %v279_v2 = vld [vmem:[%s2823_s1 + $0x68] sm:$0xff]  ;;  %v278_v3 = vld [vmem:[%s2823_s1 + $0x60] sm:$0xff]  ;;  %v277_v4 = vld [vmem:[%s2823_s1 + $0x58] sm:$0xff]  ;;  %vm333_vm1 = vcmask 523264   ;;  %vm674_vm2 = vcmask 1045504   ;;  %vm918_vm3 = vcmask 1044480  }
  0x1a   : > { %s233_s10 = scalar_select %p232_p0, %s1879_s18, 1  ;;  %1650 = vmatpush.msra.mxu3 %v281_v0  ;;  %374 = vmatpush.msra.mxu0 %v281_v0  ;;  %v276_v11 = vld [vmem:[%s2823_s1 + $0x50] sm:$0xff]  ;;  %v275_v12 = vld [vmem:[%s2823_s1 + $0x48] sm:$0xff]  ;;  %v274_v21 = vld [vmem:[%s2823_s1 + $0x40] sm:$0xff] }
  0x1b   : > { %1651 = vmatpush.msra.mxu1 %v280_v1  ;;  %1652 = vmatpush.msra.mxu2 %v280_v1  ;;  %v535_v27 = vld [vmem:[%s2824_s2 + $0x78] sm:$0xff]  ;;  %v534_v34 = vld [vmem:[%s2824_s2 + $0x70] sm:$0xff]  ;;  %v533_v41 = vld [vmem:[%s2824_s2 + $0x68] sm:$0xff]  ;;  %s229_s26 = sand.u32 1, %s1871_s16   ;;  %s1647_s6 = sshll.u32 %s1879_s18, 7 }
  0x1c   : > { %s1672_s11 = smul.u32 136, %s233_s10  ;;  %1653 = vmatpush.msra.mxu3 %v280_v1  ;;  %375 = vmatpush.msra.mxu0 %v280_v1  ;;  %v273_v29 = vld [vmem:[%s2824_s2 + $0x38] sm:$0xff]  ;;  %v272_v36 = vld [vmem:[%s2824_s2 + $0x30] sm:$0xff]  ;;  %v271_v43 = vld [vmem:[%s2824_s2 + $0x28] sm:$0xff]  ;;  %s1512_s29 = sshll.u32 %s229_s26, 7 }
  0x1d   : > { %1654 = vmatpush.msra.mxu1 %v279_v2  ;;  %1655 = vmatpush.msra.mxu2 %v279_v2  ;;  %v265_v32 = vld [vmem:[%s2823_s1 + $0x38] sm:$0xff]  ;;  %v264_v39 = vld [vmem:[%s2823_s1 + $0x30] sm:$0xff]  ;;  %v263_v44 = vld [vmem:[%s2823_s1 + $0x28] sm:$0xff]  ;;  %s2765_s5 = scalar_lea.vmem [#allocation5], %s1512_s29  ;;  %s1408_s8 = scalar_lea.hbm %s2826_s4, %s1647_s6 }
  0x1e   : > { %s1991_s30 = scalar_lea.vmem %s2822_s0, %s1672_s11  ;;  %1656 = vmatpush.msra.mxu3 %v279_v2  ;;  %376 = vmatpush.msra.mxu0 %v279_v2  ;;  %v673_v42 = vld [vmem:[%s2823_s1 + $0xb8] sm:$0xff]  ;;  %v532_v47 = vld [vmem:[%s2824_s2 + $0x60] sm:$0xff]  ;;  %v672_v56 = vld [vmem:[%s2823_s1 + $0xb0] sm:$0xff]  ;;  %s1409_s9 = sshll.u32 %s2765_s5, 4  ;;  %s1410_s9 = int_to_ptr.vmem [resolvable:$true] %s1409_s9 }
  0x1f   : > { %v2000_v5 = vld [vmem:[%s1991_s30 + $0x20] sm:$0xff]  ;;  %v2003_v6 = vld [vmem:[%s1991_s30 + $0x28] sm:$0xff]  ;;  %1657 = vmatpush.msra.mxu1 %v278_v3  ;;  %1658 = vmatpush.msra.mxu2 %v278_v3  ;;  %v2059_v28 = vld [vmem:[%s1991_s30 + $0x30] sm:$0xff]  ;;  %s1411_s10 = sshll.u32 %s1408_s8, 4  ;;  %s1396_s11 = scalar_lea.sflag [#allocation4], %s229_s26  ;;  %s1412_s10 = int_to_ptr.hbm [resolvable:$true] %s1411_s10 }
  0x20   : > { %v2006_v7 = vld [vmem:[%s1991_s30 + $0x40] sm:$0xff]  ;;  %v2009_v8 = vld [vmem:[%s1991_s30 + $0x48] sm:$0xff]  ;;  %1659 = vmatpush.msra.mxu3 %v278_v3  ;;  %377 = vmatpush.msra.mxu0 %v278_v3  ;;  %v307_v13 = vrot.slane %v2000_v5, 1  ;;  %v309_v14 = vrot.slane %v2003_v6, 1  ;;  %v2065_v30 = vld [vmem:[%s1991_s30 + $0x50] sm:$0xff]  ;;  %v311_v35 = vrot.slane %v2059_v28, 1 }
  0x21   : > { %v2012_v9 = vld [vmem:[%s1991_s30 + $0x60] sm:$0xff]  ;;  %v2015_v10 = vld [vmem:[%s1991_s30 + $0x68] sm:$0xff]  ;;  %1660 = vmatpush.msra.mxu1 %v277_v4  ;;  %1661 = vmatpush.msra.mxu2 %v277_v4  ;;  %v315_v15 = vrot.slane %v2006_v7, 1  ;;  %v317_v16 = vrot.slane %v2009_v8, 1  ;;  %v2068_v31 = vld [vmem:[%s1991_s30 + $0x70] sm:$0xff]  ;;  %v319_v37 = vrot.slane %v2065_v30, 1 }
  0x22   : > { %1662 = vmatpush.msra.mxu3 %v277_v4  ;;  %378 = vmatpush.msra.mxu0 %v277_v4  ;;  %v323_v17 = vrot.slane %v2012_v9, 1  ;;  %v325_v18 = vrot.slane %v2015_v10, 1  ;;  %v2030_v19 = vld [vmem:[%s1991_s30] sm:$0xff]  ;;  %v2033_v20 = vld [vmem:[%s1991_s30 + $0x8] sm:$0xff]  ;;  %v2041_v22 = vsel %vm299_vm0, %v307_v13, %v309_v14  ;;  %v327_v38 = vrot.slane %v2068_v31, 1  ;;  %v2095_v40 = vld [vmem:[%s1991_s30 + $0x10] sm:$0xff] }
  0x23   : > { %1663 = vmatpush.msra.mxu1 %v276_v11  ;;  %1664 = vmatpush.msra.mxu2 %v276_v11  ;;  %v300_v23 = vrot.slane %v2030_v19, 1  ;;  %v301_v24 = vrot.slane %v2033_v20, 1  ;;  %v2048_v25 = vsel %vm299_vm0, %v315_v15, %v317_v16  ;;  %v2112_v45 = vsel %vm299_vm0, %v309_v14, %v311_v35  ;;  %v270_v50 = vld [vmem:[%s2824_s2 + $0x20] sm:$0xff]  ;;  %v2128_v51 = vld [vmem:[%s1991_s30 + $0x38] sm:$0xff]  ;;  %v530_v0 = vld [vmem:[%s2824_s2 + $0x50] sm:$0xff]  ;;  %s1819_s12 = sshra.s32 %s1412_s10, 4  ;;  %s1820_s12 = int_to_ptr.hbm [resolvable:$true] %s1819_s12 }
  0x24   : > { %1665 = vmatpush.msra.mxu3 %v276_v11  ;;  %379 = vmatpush.msra.mxu0 %v276_v11  ;;  %v2053_v26 = vsel %vm299_vm0, %v323_v17, %v325_v18  ;;  %v303_v46 = vrot.slane %v2095_v40, 1  ;;  %v2119_v48 = vsel %vm299_vm0, %v317_v16, %v319_v37  ;;  %v2122_v49 = vsel %vm299_vm0, %v325_v18, %v327_v38  ;;  %v2131_v52 = vld [vmem:[%s1991_s30 + $0x58] sm:$0xff]  ;;  %v262_v54 = vld [vmem:[%s2823_s1 + $0x20] sm:$0xff]  ;;  %v268_v1 = vld [vmem:[%s2824_s2 + $0x10] sm:$0xff]  ;;  %s1821_s13 = scalar_lea.hbm %s1820_s12, 128  ;;  %s1825_s21 = scalar_lea.hbm %s2826_s4, 256 }
  0x25   : > { %1666 = vmatpush.msra.mxu1 %v275_v12  ;;  %1667 = vmatpush.msra.mxu2 %v275_v12  ;;  %v2080_v33 = vsel %vm299_vm0, %v300_v23, %v301_v24  ;;  %v2134_v53 = vld [vmem:[%s1991_s30 + $0x78] sm:$0xff]  ;;  %v313_v58 = vrot.slane %v2128_v51, 1  ;;  %v321_v60 = vrot.slane %v2131_v52, 1  ;;  %v671_v2 = vld [vmem:[%s2823_s1 + $0xa8] sm:$0xff]  ;;  %v260_v3 = vld [vmem:[%s2823_s1 + $0x10] sm:$0xff]  ;;  %p1822_p1 = scmp.ne.s32.totalorder %s1820_s12, %s1821_s13  ;;  %p1826_p5 = scmp.lt.s32.totalorder %s1820_s12, %s2826_s4 }
  0x26   : > { %1668 = vmatpush.msra.mxu3 %v275_v12  ;;  %380 = vmatpush.msra.mxu0 %v275_v12  ;;  %v531_v55 = vld [vmem:[%s2824_s2 + $0x58] sm:$0xff]  ;;  %v2152_v57 = vsel %vm299_vm0, %v301_v24, %v303_v46  ;;  %v329_v61 = vrot.slane %v2134_v53, 1  ;;  %v529_v4 = vld [vmem:[%s2824_s2 + $0x48] sm:$0xff]  ;;  %v670_v23 = vld [vmem:[%s2823_s1 + $0xa0] sm:$0xff]  ;;  %p1827_p6 = scmp.lt.s32.totalorder %s1825_s21, %s1821_s13 }
  0x27   : > { %1669 = vmatpush.msra.mxu1 %v274_v21  ;;  %1670 = vmatpush.msra.mxu2 %v274_v21  ;;  %v269_v59 = vld [vmem:[%s2824_s2 + $0x18] sm:$0xff]  ;;  %v2184_v11 = vsel %vm299_vm0, %v311_v35, %v313_v58  ;;  %v267_v14 = vld [vmem:[%s2824_s2 + $0x8] sm:$0xff]  ;;  %v2191_v16 = vsel %vm299_vm0, %v319_v37, %v321_v60  ;;  %p1823_p2 = pnand %p1822_p1, %p1959_p4 }
  0x28   : > { %1671 = vmatpush.msra.mxu3 %v274_v21  ;;  %1518 = vmatmul.msk.f32.vlgmr.msra.gmra.mxu1 %vm333_vm1, %v2041_v22  ;;  %v2161_v62 = vld [vmem:[%s1991_s30 + $0x18] sm:$0xff]  ;;  %v2194_v18 = vsel %vm299_vm0, %v327_v38, %v329_v61  ;;  %v259_v24 = vld [vmem:[%s2823_s1 + $0x8] sm:$0xff]  ;;  %p1828_p7 = por %p1827_p6, %p1826_p5 }
  0x29   : > { %1522 = vmatmul.msk.f32.vlgmr.msra.gmra.mxu2 %vm333_vm1, %v2048_v25  ;;  %1526 = vmatmul.msk.f32.vlgmr.msra.gmra.mxu3 %vm333_vm1, %v2053_v26  ;;  %v261_v63 = vld [vmem:[%s2823_s1 + $0x18] sm:$0xff]  ;;  %v305_v12 = vrot.slane %v2161_v62, 1  ;;  %p1824_p3 = pneg %p1823_p2 }
  0x2a   : > { %544 = vmatpush.msrb.mxu2 %v535_v27  ;;  %609 = vmatpush.msrb.mxu3 %v273_v29  ;;  %v528_v27 = vld [vmem:[%s2824_s2 + $0x40] sm:$0xff]  ;;  %v917_v37 = vld [vmem:[%s2823_s1 + $0xf8] sm:$0xff] }
  0x2b   : > { %381 = vmatpush.msra.mxu0 %v274_v21  ;;  %471 = vmatpush.msrb.mxu1 %v265_v32  ;;  %v2197_v21 = vld [vmem:[%s1991_s30 + $0x80] sm:$0xff]  ;;  %v306_v32 = vsel %vm299_vm0, %v303_v46, %v305_v12  ;;  %v1072_v38 = vld [vmem:[%s2824_s2 + $0xf8] sm:$0xff]  ;;  %v2252_v46 = vsel %vm299_vm0, %v321_v60, %v323_v17  ;;  %v308_v17 = vsel %vm299_vm0, %v305_v12, %v307_v13  ;;  %v678_v60 = vrot.slane %v2095_v40, 2  ;;  %p1829_p9 = pnand %p1828_p7, %p1824_p3 }
  0x2c   : > { %1514 = vmatmul.msk.f32.vlgmr.msra.gmra.mxu0 %vm333_vm1, %v2080_v33  ;;  %545 = vmatpush.msrb.mxu2 %v534_v34  ;;  %v266_v29 = vld [vmem:[%s2824_s2] sm:$0xff]  ;;  %v331_v35 = vrot.slane %v2197_v21, 1  ;;  %v684_v12 = vrot.slane %v2003_v6, 2 }
  0x2d   : > { %610 = vmatpush.msrb.mxu3 %v272_v36  ;;  %472 = vmatpush.msrb.mxu1 %v264_v39  ;;  %v258_v34 = vld [vmem:[%s2823_s1] sm:$0xff]  ;;  %v669_v36 = vld [vmem:[%s2823_s1 + $0x98] sm:$0xff] }
  0x2e   : > { %546 = vmatpush.msrb.mxu2 %v533_v41  ;;  %748 = vmatpush.msrb.mxu0 %v673_v42  ;;  %v828_v39 = vld [vmem:[%s2824_s2 + $0xb8] sm:$0xff]  ;;  %v668_v41 = vld [vmem:[%s2823_s1 + $0x90] sm:$0xff] }
  0x2f   : > { %611 = vmatpush.msrb.mxu3 %v271_v43  ;;  %473 = vmatpush.msrb.mxu1 %v263_v44  ;;  %v916_v42 = vld [vmem:[%s2823_s1 + $0xf0] sm:$0xff]  ;;  %v2244_v43 = vsel %vm299_vm0, %v313_v58, %v315_v15  ;;  %v667_v15 = vld [vmem:[%s2823_s1 + $0x88] sm:$0xff] }
  0x30   : > { %1519 = vmatmul.msk.f32.gmra.mxu1 %vm333_vm1, %v2112_v45  ;;  %547 = vmatpush.msrb.mxu2 %v532_v47  ;;  %v1071_v44 = vld [vmem:[%s2824_s2 + $0xf0] sm:$0xff]  ;;  %v2255_v47 = vsel %vm299_vm0, %v329_v61, %v331_v35  ;;  %v915_v58 = vld [vmem:[%s2823_s1 + $0xe8] sm:$0xff] }
  0x31   : > { %1523 = vmatmul.msk.f32.gmra.mxu2 %vm333_vm1, %v2119_v48  ;;  %1527 = vmatmul.msk.f32.gmra.mxu3 %vm333_vm1, %v2122_v49  ;;  %v1067_v35 = vld [vmem:[%s2824_s2 + $0xd0] sm:$0xff] }
  0x32   : > { %612 = vmatpush.msrb.mxu3 %v270_v50  ;;  %474 = vmatpush.msrb.mxu1 %v262_v54  ;;  %v827_v50 = vld [vmem:[%s2824_s2 + $0xb0] sm:$0xff]  ;;  %v666_v54 = vld [vmem:[%s2823_s1 + $0x80] sm:$0xff] }
  0x33   : > { %548 = vmatpush.msrb.mxu2 %v531_v55  ;;  %749 = vmatpush.msrb.mxu0 %v672_v56  ;;  %v675_v55 = vrot.slane %v2030_v19, 2  ;;  %v676_v56 = vrot.slane %v2033_v20, 2 }
  0x34   : > { %1515 = vmatmul.msk.f32.gmra.mxu0 %vm333_vm1, %v2152_v57  ;;  %613 = vmatpush.msrb.mxu3 %v269_v59  ;;  %v1070_v59 = vld [vmem:[%s2824_s2 + $0xe8] sm:$0xff] }
  0x35   : > { %475 = vmatpush.msrb.mxu1 %v261_v63  ;;  %549 = vmatpush.msrb.mxu2 %v530_v0  ;;  %v2285_v13 = vsel %vm674_vm2, %v675_v55, %v676_v56  ;;  %v2306_v61 = vsel %vm674_vm2, %v676_v56, %v678_v60  ;;  %v680_v63 = vrot.slane %v2161_v62, 2  ;;  %v914_v0 = vld [vmem:[%s2823_s1 + $0xe0] sm:$0xff] }
  0x36   : > { %614 = vmatpush.msrb.mxu3 %v268_v1  ;;  %750 = vmatpush.msrb.mxu0 %v671_v2  ;;  %v1069_v1 = vld [vmem:[%s2824_s2 + $0xe0] sm:$0xff] }
  0x37   : > { %476 = vmatpush.msrb.mxu1 %v260_v3  ;;  %550 = vmatpush.msrb.mxu2 %v529_v4  ;;  %v825_v2 = vld [vmem:[%s2824_s2 + $0xa0] sm:$0xff]  ;;  %v682_v3 = vrot.slane %v2000_v5, 2 }
  0x38   : > { %1520 = vmatmul.msk.f32.gmra.mxu1 %vm333_vm1, %v2184_v11  ;;  %615 = vmatpush.msrb.mxu3 %v267_v14 }
  0x39   : > { %1524 = vmatmul.msk.f32.gmra.mxu2 %vm333_vm1, %v2191_v16  ;;  %1528 = vmatmul.msk.f32.gmra.mxu3 %vm333_vm1, %v2194_v18  ;;  %v2337_v4 = vsel %vm674_vm2, %v680_v63, %v682_v3  ;;  %v2349_v14 = vsel %vm674_vm2, %v682_v3, %v684_v12 }
  0x3a   : > { %751 = vmatpush.msrb.mxu0 %v670_v23  ;;  %477 = vmatpush.msrb.mxu1 %v259_v24  ;;  %v913_v23 = vld [vmem:[%s2823_s1 + $0xd8] sm:$0xff] }
  0x3b   : > { %551 = vmatpush.msrb.mxu2 %v528_v27  ;;  %616 = vmatpush.msrb.mxu3 %v266_v29  ;;  %v1068_v24 = vld [vmem:[%s2824_s2 + $0xd8] sm:$0xff]  ;;  %v686_v27 = vrot.slane %v2059_v28, 2 }
  0x3c   : > { %1516 = vmatmul.msk.f32.gmra.mxu0 %vm333_vm1, %v306_v32  ;;  %478 = vmatpush.msrb.mxu1 %v258_v34  ;;  %v912_v34 = vld [vmem:[%s2823_s1 + $0xd0] sm:$0xff] }
  0x3d   : > { %752 = vmatpush.msrb.mxu0 %v669_v36  ;;  %992 = vmatpush.msra.mxu2 %v917_v37  ;;  %v2370_v29 = vsel %vm674_vm2, %v684_v12, %v686_v27  ;;  %v690_v36 = vrot.slane %v2006_v7, 2  ;;  %v704_v12 = vrot.slane %v2134_v53, 2 }
  0x3e   : > { %1081 = vmatpush.msra.mxu3 %v1072_v38  ;;  %837 = vmatpush.msra.mxu1 %v828_v39  ;;  %v692_v38 = vrot.slane %v2009_v8, 2 }
  0x3f   : > { %753 = vmatpush.msrb.mxu0 %v668_v41  ;;  %993 = vmatpush.msra.mxu2 %v916_v42  ;;  %v911_v41 = vld [vmem:[%s2823_s1 + $0xc8] sm:$0xff] }
  0x40   : > { %1521 = vmatmul.msk.f32.gmra.mxu1 %vm333_vm1, %v2244_v43  ;;  %1082 = vmatpush.msra.mxu3 %v1071_v44  ;;  %v2415_v39 = vsel %vm674_vm2, %v690_v36, %v692_v38  ;;  %v1066_v42 = vld [vmem:[%s2824_s2 + $0xc8] sm:$0xff] }
  0x41   : > { %1525 = vmatmul.msk.f32.gmra.mxu2 %vm333_vm1, %v2252_v46  ;;  %1529 = vmatmul.msk.f32.gmra.mxu3 %vm333_vm1, %v2255_v47 }
  0x42   : > { %754 = vmatpush.msrb.mxu0 %v667_v15  ;;  %838 = vmatpush.msra.mxu1 %v827_v50  ;;  %v696_v15 = vrot.slane %v2131_v52, 2  ;;  %v910_v50 = vld [vmem:[%s2823_s1 + $0xc0] sm:$0xff] }
  0x43   : > { %994 = vmatpush.msra.mxu2 %v915_v58  ;;  %1083 = vmatpush.msra.mxu3 %v1070_v59  ;;  %v700_v58 = vrot.slane %v2015_v10, 2 }
  0x44   : > { %1517 = vmatmul.msk.f32.gmra.mxu0 %vm333_vm1, %v308_v17 }
  0x45   : > { %755 = vmatpush.msrb.mxu0 %v666_v54  ;;  %995 = vmatpush.msra.mxu2 %v914_v0  ;;  %v698_v54 = vrot.slane %v2012_v9, 2  ;;  %v1217_v0 = vld [vmem:[#allocation2 + $0x78] sm:$0xff] }
  0x46   : > { %1084 = vmatpush.msra.mxu3 %v1069_v1 }
  0x47   : > { %996 = vmatpush.msra.mxu2 %v913_v23  ;;  %v2469_v55 = vsel %vm674_vm2, %v696_v15, %v698_v54  ;;  %1218 = vmatpush.msra.mxu0 %v1217_v0  ;;  %v1216_v23 = vld [vmem:[#allocation2 + $0x70] sm:$0xff] }
  0x48   : > { %1530 = vmatmul.msk.f32.vlgmr.msrb.gmra.mxu1 %vm333_vm1, %v2030_v19  ;;  %1085 = vmatpush.msra.mxu3 %v1068_v24 }
  0x49   : > { %1546 = vmatmul.msk.f32.vlgmr.msrb.gmra.mxu2 %vm333_vm1, %v2080_v33  ;;  %1562 = vmatmul.msk.f32.vlgmr.msrb.gmra.mxu3 %vm333_vm1, %v2030_v19  ;;  %v826_v33 = vld [vmem:[%s2824_s2 + $0xa8] sm:$0xff] }
  0x4a   : > { %839 = vmatpush.msra.mxu1 %v826_v33  ;;  %997 = vmatpush.msra.mxu2 %v912_v34  ;;  %v919_v34 = vrot.slane %v2030_v19, 3  ;;  %v922_v19 = vrot.slane %v2095_v40, 3 }
  0x4b   : > { %1086 = vmatpush.msra.mxu3 %v1067_v35  ;;  %1219 = vmatpush.msra.mxu0 %v1216_v23  ;;  %v920_v35 = vrot.slane %v2033_v20, 3 }
  0x4c   : > { %1578 = vmatmul.msk.f32.vlgmr.msrb.gmra.mxu0 %vm333_vm1, %v2285_v13  ;;  %840 = vmatpush.msra.mxu1 %v825_v2 }
  0x4d   : > { %998 = vmatpush.msra.mxu2 %v911_v41  ;;  %1087 = vmatpush.msra.mxu3 %v1066_v42  ;;  %v921_v41 = vsel %vm918_vm3, %v919_v34, %v920_v35 }
  0x4f   : > { %999 = vmatpush.msra.mxu2 %v910_v50  ;;  %v923_v50 = vsel %vm918_vm3, %v920_v35, %v922_v19 }
  0x50   : > { %1531 = vmatmul.msk.f32.gmra.mxu1 %vm333_vm1, %v2033_v20 }
  0x51   : > { %1547 = vmatmul.msk.f32.gmra.mxu2 %vm333_vm1, %v2152_v57  ;;  %1563 = vmatmul.msk.f32.gmra.mxu3 %vm333_vm1, %v2033_v20  ;;  %v2317_v57 = vsel %vm674_vm2, %v678_v60, %v680_v63  ;;  %v702_v63 = vrot.slane %v2068_v31, 2  ;;  %v1214_v20 = vld [vmem:[#allocation2 + $0x60] sm:$0xff] }
  0x54   : > { %1579 = vmatmul.msk.f32.gmra.mxu0 %vm333_vm1, %v2306_v61 }
  0x58   : > { %1532 = vmatmul.msk.f32.gmra.mxu1 %vm333_vm1, %v2095_v40 }
  0x59   : > { %1548 = vmatmul.msk.f32.gmra.mxu2 %vm333_vm1, %v306_v32  ;;  %1564 = vmatmul.msk.f32.gmra.mxu3 %vm333_vm1, %v2095_v40  ;;  %v688_v32 = vrot.slane %v2128_v51, 2  ;;  %v1213_v40 = vld [vmem:[#allocation2 + $0x58] sm:$0xff] }
  0x5b   : > { %v2403_v37 = vsel %vm674_vm2, %v688_v32, %v690_v36 }
  0x5c   : > { %1580 = vmatmul.msk.f32.gmra.mxu0 %vm333_vm1, %v2317_v57 }
  0x60   : > { %1533 = vmatmul.msk.f32.gmra.mxu1 %vm333_vm1, %v2161_v62 }
  0x61   : > { %1549 = vmatmul.msk.f32.gmra.mxu2 %vm333_vm1, %v308_v17  ;;  %1565 = vmatmul.msk.f32.gmra.mxu3 %vm333_vm1, %v2161_v62  ;;  %v1065_v17 = vld [vmem:[%s2824_s2 + $0xc0] sm:$0xff] }
  0x62   : > { %1088 = vmatpush.msra.mxu3 %v1065_v17 }
  0x64   : > { %1581 = vmatmul.msk.f32.gmra.mxu0 %vm333_vm1, %v2337_v4 }
  0x68   : > { %1534 = vmatmul.msk.f32.gmra.mxu1 %vm333_vm1, %v2000_v5 }
  0x69   : > { %1550 = vmatmul.msk.f32.gmra.mxu2 %vm333_vm1, %v2041_v22  ;;  %1566 = vmatmul.msk.f32.gmra.mxu3 %vm333_vm1, %v2000_v5  ;;  %v824_v22 = vld [vmem:[%s2824_s2 + $0x98] sm:$0xff] }
  0x6a   : > { %841 = vmatpush.msra.mxu1 %v824_v22 }
  0x6c   : > { %1582 = vmatmul.msk.f32.gmra.mxu0 %vm333_vm1, %v2349_v14 }
  0x70   : > { %1535 = vmatmul.msk.f32.gmra.mxu1 %vm333_vm1, %v2003_v6 }
  0x71   : > { %1551 = vmatmul.msk.f32.gmra.mxu2 %vm333_vm1, %v2112_v45  ;;  %1567 = vmatmul.msk.f32.gmra.mxu3 %vm333_vm1, %v2003_v6  ;;  %v2382_v45 = vsel %vm674_vm2, %v686_v27, %v688_v32  ;;  %v706_v32 = vrot.slane %v2197_v21, 2 }
  0x74   : > { %1583 = vmatmul.msk.f32.gmra.mxu0 %vm333_vm1, %v2370_v29 }
  0x78   : > { %1536 = vmatmul.msk.f32.gmra.mxu1 %vm333_vm1, %v2059_v28 }
  0x79   : > { %1552 = vmatmul.msk.f32.gmra.mxu2 %vm333_vm1, %v2184_v11  ;;  %1568 = vmatmul.msk.f32.gmra.mxu3 %vm333_vm1, %v2059_v28  ;;  %v823_v11 = vld [vmem:[%s2824_s2 + $0x90] sm:$0xff] }
  0x7a   : > { %842 = vmatpush.msra.mxu1 %v823_v11  ;;  %v1215_v11 = vld [vmem:[#allocation2 + $0x68] sm:$0xff] }
  0x7b   : > { %1220 = vmatpush.msra.mxu0 %v1215_v11 }
  0x7c   : > { %1584 = vmatmul.msk.f32.gmra.mxu0 %vm333_vm1, %v2382_v45 }
  0x7d   : > { %1221 = vmatpush.msra.mxu0 %v1214_v20 }
  0x7f   : > { %1222 = vmatpush.msra.mxu0 %v1213_v40 }
  0x80   : > { %1537 = vmatmul.msk.f32.gmra.mxu1 %vm333_vm1, %v2128_v51 }
  0x81   : > { %1553 = vmatmul.msk.f32.gmra.mxu2 %vm333_vm1, %v2244_v43  ;;  %1569 = vmatmul.msk.f32.gmra.mxu3 %vm333_vm1, %v2128_v51  ;;  %v694_v43 = vrot.slane %v2065_v30, 2 }
  0x83   : > { %v2436_v44 = vsel %vm674_vm2, %v692_v38, %v694_v43 }
  0x84   : > { %1585 = vmatmul.msk.f32.gmra.mxu0 %vm333_vm1, %v2403_v37 }
  0x88   : > { %1538 = vmatmul.msk.f32.gmra.mxu1 %vm333_vm1, %v2006_v7 }
  0x89   : > { %1554 = vmatmul.msk.f32.gmra.mxu2 %vm333_vm1, %v2048_v25  ;;  %1570 = vmatmul.msk.f32.gmra.mxu3 %vm333_vm1, %v2006_v7  ;;  %v822_v25 = vld [vmem:[%s2824_s2 + $0x88] sm:$0xff] }
  0x8a   : > { %843 = vmatpush.msra.mxu1 %v822_v25 }
  0x8c   : > { %1586 = vmatmul.msk.f32.gmra.mxu0 %vm333_vm1, %v2415_v39 }
  0x90   : > { %1539 = vmatmul.msk.f32.gmra.mxu1 %vm333_vm1, %v2009_v8 }
  0x91   : > { %1555 = vmatmul.msk.f32.gmra.mxu2 %vm333_vm1, %v2119_v48  ;;  %1571 = vmatmul.msk.f32.gmra.mxu3 %vm333_vm1, %v2009_v8  ;;  %v2448_v48 = vsel %vm674_vm2, %v694_v43, %v696_v15 }
  0x94   : > { %1587 = vmatmul.msk.f32.gmra.mxu0 %vm333_vm1, %v2436_v44 }
  0x98   : > { %1540 = vmatmul.msk.f32.gmra.mxu1 %vm333_vm1, %v2065_v30 }
  0x99   : > { %1556 = vmatmul.msk.f32.gmra.mxu2 %vm333_vm1, %v2191_v16  ;;  %1572 = vmatmul.msk.f32.gmra.mxu3 %vm333_vm1, %v2065_v30  ;;  %v821_v16 = vld [vmem:[%s2824_s2 + $0x80] sm:$0xff] }
  0x9a   : > { %844 = vmatpush.msra.mxu1 %v821_v16 }
  0x9c   : > { %1588 = vmatmul.msk.f32.gmra.mxu0 %vm333_vm1, %v2448_v48 }
  0xa0   : > { %1541 = vmatmul.msk.f32.gmra.mxu1 %vm333_vm1, %v2131_v52 }
  0xa1   : > { %1557 = vmatmul.msk.f32.gmra.mxu2 %vm333_vm1, %v2252_v46  ;;  %1573 = vmatmul.msk.f32.gmra.mxu3 %vm333_vm1, %v2131_v52  ;;  %v2483_v46 = vsel %vm674_vm2, %v698_v54, %v700_v58 }
  0xa4   : > { %1589 = vmatmul.msk.f32.gmra.mxu0 %vm333_vm1, %v2469_v55 }
  0xa5   : > { %v2473_v56 = vpop.f32.mrf.mxu1 }
  0xa8   : > { %1542 = vmatmul.msk.f32.gmra.mxu1 %vm333_vm1, %v2012_v9 }
  0xa9   : > { %1558 = vmatmul.msk.f32.gmra.mxu2 %vm333_vm1, %v2053_v26  ;;  %1574 = vmatmul.msk.f32.gmra.mxu3 %vm333_vm1, %v2012_v9  ;;  %v2501_v26 = vsel %vm674_vm2, %v700_v58, %v702_v63 }
  0xac   : > { %1590 = vmatmul.msk.f32.gmra.mxu0 %vm333_vm1, %v2483_v46  ;;  %v2487_v59 = vpop.f32.mrf.mxu2  ;;  %v2489_v33 = vpop.f32.mrf.mxu3 }
  0xad   : > { %v2491_v60 = vpop.f32.mrf.mxu1 }
  0xb0   : > { %1543 = vmatmul.msk.f32.gmra.mxu1 %vm333_vm1, %v2015_v10 }
  0xb1   : > { %1559 = vmatmul.msk.f32.gmra.mxu2 %vm333_vm1, %v2122_v49  ;;  %1575 = vmatmul.msk.f32.gmra.mxu3 %vm333_vm1, %v2015_v10  ;;  %v2519_v49 = vsel %vm674_vm2, %v702_v63, %v704_v12 }
  0xb4   : > { %1591 = vmatmul.msk.f32.gmra.mxu0 %vm333_vm1, %v2501_v26  ;;  %v2505_v1 = vpop.f32.mrf.mxu2  ;;  %v2507_v2 = vpop.f32.mrf.mxu3 }
  0xb5   : > { %v2509_v3 = vpop.f32.mrf.mxu1 }
  0xb8   : > { %1544 = vmatmul.msk.f32.gmra.mxu1 %vm333_vm1, %v2068_v31 }
  0xb9   : > { %1560 = vmatmul.msk.f32.gmra.mxu2 %vm333_vm1, %v2194_v18  ;;  %1576 = vmatmul.msk.f32.gmra.mxu3 %vm333_vm1, %v2068_v31  ;;  %v2537_v18 = vsel %vm674_vm2, %v704_v12, %v706_v32 }
  0xbc   : > { %1592 = vmatmul.msk.f32.gmra.mxu0 %vm333_vm1, %v2519_v49  ;;  %v2523_v24 = vpop.f32.mrf.mxu2  ;;  %v2525_v22 = vpop.f32.mrf.mxu3 }
  0xbd   : > { %v2527_v27 = vpop.f32.mrf.mxu1 }
  0xc0   : > { %1545 = vmatmul.msk.f32.gmra.mxu1 %vm333_vm1, %v2134_v53 }
  0xc1   : > { %1561 = vmatmul.msk.f32.gmra.mxu2 %vm333_vm1, %v2255_v47  ;;  %1577 = vmatmul.msk.f32.gmra.mxu3 %vm333_vm1, %v2134_v53 }
  0xc4   : > { %1593 = vmatmul.msk.f32.gmra.mxu0 %vm333_vm1, %v2537_v18  ;;  %v2543_v36 = vpop.f32.mrf.mxu2  ;;  %v2545_v38 = vpop.f32.mrf.mxu3 }
  0xc5   : > { %2829 = vst [vmem:[#allocation8_spill] sm:$0xff] %v2545_v38  ;;  %v2547_v47 = vpop.f32.mrf.mxu1 }
  0xc8   : > { %1594 = vmatmul.msk.f32.vlgmr.msra.gmra.mxu1 %vm333_vm1, %v2285_v13  ;;  %v924_v13 = vrot.slane %v2161_v62, 3  ;;  %v1212_v62 = vld [vmem:[#allocation2 + $0x50] sm:$0xff] }
  0xc9   : > { %1610 = vmatmul.msk.f32.vlgmr.msra.gmra.mxu2 %vm333_vm1, %v921_v41  ;;  %1626 = vmatmul.msk.f32.vlgmr.msra.gmra.mxu3 %vm333_vm1, %v921_v41 }
  0xca   : > { %v925_v63 = vsel %vm918_vm3, %v922_v19, %v924_v13  ;;  %1223 = vmatpush.msra.mxu0 %v1212_v62 }
  0xcc   : > { %v553_v42 = vpop.f32.mrf.mxu2  ;;  %v618_v25 = vpop.f32.mrf.mxu3 }
  0xcd   : > { %v2555_v43 = vadd.f32 %v618_v25, %v553_v42  ;;  %v2557_v15 = vpop.f32.mrf.mxu1 }
  0xd0   : > { %1595 = vmatmul.msk.f32.gmra.mxu1 %vm333_vm1, %v2306_v61  ;;  %v926_v61 = vrot.slane %v2000_v5, 3  ;;  %v1211_v5 = vld [vmem:[#allocation2 + $0x48] sm:$0xff] }
  0xd1   : > { %1611 = vmatmul.msk.f32.gmra.mxu2 %vm333_vm1, %v923_v50  ;;  %1627 = vmatmul.msk.f32.gmra.mxu3 %vm333_vm1, %v923_v50 }
  0xd2   : > { %v927_v34 = vsel %vm918_vm3, %v924_v13, %v926_v61  ;;  %1224 = vmatpush.msra.mxu0 %v1211_v5 }
  0xd4   : > { %v556_v17 = vpop.f32.mrf.mxu2  ;;  %v621_v16 = vpop.f32.mrf.mxu3 }
  0xd5   : > { %v2565_v54 = vadd.f32 %v621_v16, %v556_v17  ;;  %v2567_v58 = vpop.f32.mrf.mxu1 }
  0xd8   : > { %1596 = vmatmul.msk.f32.gmra.mxu1 %vm333_vm1, %v2317_v57  ;;  %v928_v57 = vrot.slane %v2003_v6, 3  ;;  %v1210_v6 = vld [vmem:[#allocation2 + $0x40] sm:$0xff] }
  0xd9   : > { %1612 = vmatmul.msk.f32.gmra.mxu2 %vm333_vm1, %v925_v63  ;;  %1628 = vmatmul.msk.f32.gmra.mxu3 %vm333_vm1, %v925_v63 }
  0xda   : > { %v929_v20 = vsel %vm918_vm3, %v926_v61, %v928_v57  ;;  %1225 = vmatpush.msra.mxu0 %v1210_v6 }
  0xdc   : > { %v559_v0 = vpop.f32.mrf.mxu2  ;;  %v624_v12 = vpop.f32.mrf.mxu3 }
  0xdd   : > { %v2575_v23 = vadd.f32 %v624_v12, %v559_v0  ;;  %v2577_v32 = vpop.f32.mrf.mxu1 }
  0xe0   : > { %1597 = vmatmul.msk.f32.gmra.mxu1 %vm333_vm1, %v2337_v4  ;;  %v930_v4 = vrot.slane %v2059_v28, 3  ;;  %v1209_v28 = vld [vmem:[#allocation2 + $0x38] sm:$0xff] }
  0xe1   : > { %1613 = vmatmul.msk.f32.gmra.mxu2 %vm333_vm1, %v927_v34  ;;  %1629 = vmatmul.msk.f32.gmra.mxu3 %vm333_vm1, %v927_v34 }
  0xe2   : > { %v931_v40 = vsel %vm918_vm3, %v928_v57, %v930_v4  ;;  %1226 = vmatpush.msra.mxu0 %v1209_v28 }
  0xe4   : > { %v562_v35 = vpop.f32.mrf.mxu2  ;;  %v627_v11 = vpop.f32.mrf.mxu3 }
  0xe5   : > { %v2585_v41 = vadd.f32 %v627_v11, %v562_v35  ;;  %v2587_v19 = vpop.f32.mrf.mxu1  ;;  %v1207_v35 = vld [vmem:[#allocation2 + $0x28] sm:$0xff] }
  0xe8   : > { %1598 = vmatmul.msk.f32.gmra.mxu1 %vm333_vm1, %v2349_v14  ;;  %v932_v14 = vrot.slane %v2128_v51, 3  ;;  %v1208_v51 = vld [vmem:[#allocation2 + $0x30] sm:$0xff] }
  0xe9   : > { %1614 = vmatmul.msk.f32.gmra.mxu2 %vm333_vm1, %v929_v20  ;;  %1630 = vmatmul.msk.f32.gmra.mxu3 %vm333_vm1, %v929_v20 }
  0xea   : > { %v933_v62 = vsel %vm918_vm3, %v930_v4, %v932_v14  ;;  %1227 = vmatpush.msra.mxu0 %v1208_v51 }
  0xec   : > { %v565_v42 = vpop.f32.mrf.mxu2  ;;  %v630_v25 = vpop.f32.mrf.mxu3  ;;  %1228 = vmatpush.msra.mxu0 %v1207_v35 }
  0xed   : > { %v2595_v50 = vadd.f32 %v630_v25, %v565_v42  ;;  %v2597_v13 = vpop.f32.mrf.mxu1 }
  0xf0   : > { %1599 = vmatmul.msk.f32.gmra.mxu1 %vm333_vm1, %v2370_v29  ;;  %v934_v29 = vrot.slane %v2006_v7, 3  ;;  %v936_v7 = vrot.slane %v2009_v8, 3  ;;  %v1206_v8 = vld [vmem:[#allocation2 + $0x20] sm:$0xff] }
  0xf1   : > { %1615 = vmatmul.msk.f32.gmra.mxu2 %vm333_vm1, %v931_v40  ;;  %1631 = vmatmul.msk.f32.gmra.mxu3 %vm333_vm1, %v931_v40 }
  0xf2   : > { %v935_v5 = vsel %vm918_vm3, %v932_v14, %v934_v29  ;;  %v937_v42 = vsel %vm918_vm3, %v934_v29, %v936_v7  ;;  %1229 = vmatpush.msra.mxu0 %v1206_v8 }
  0xf4   : > { %v568_v17 = vpop.f32.mrf.mxu2  ;;  %v633_v16 = vpop.f32.mrf.mxu3 }
  0xf5   : > { %v2605_v63 = vadd.f32 %v633_v16, %v568_v17  ;;  %v2607_v61 = vpop.f32.mrf.mxu1 }
  0xf8   : > { %1600 = vmatmul.msk.f32.gmra.mxu1 %vm333_vm1, %v2382_v45  ;;  %v2622_v45 = vpop.f32.mrf.mxu0 }
  0xf9   : > { %1616 = vmatmul.msk.f32.gmra.mxu2 %vm333_vm1, %v933_v62  ;;  %1632 = vmatmul.msk.f32.gmra.mxu3 %vm333_vm1, %v933_v62 }
  0xfc   : > { %v571_v0 = vpop.f32.mrf.mxu2  ;;  %v636_v12 = vpop.f32.mrf.mxu3 }
  0xfd   : > { %v2615_v34 = vadd.f32 %v636_v12, %v571_v0  ;;  %v2617_v57 = vpop.f32.mrf.mxu1 }
 0x100   : > { %1601 = vmatmul.msk.f32.gmra.mxu1 %vm333_vm1, %v2403_v37  ;;  %v938_v37 = vrot.slane %v2065_v30, 3  ;;  %v2637_v25 = vpop.f32.mrf.mxu0  ;;  %v940_v30 = vrot.slane %v2131_v52, 3  ;;  %v942_v52 = vrot.slane %v2012_v9, 3  ;;  %v944_v9 = vrot.slane %v2015_v10, 3 }
 0x101   : > { %1617 = vmatmul.msk.f32.gmra.mxu2 %vm333_vm1, %v935_v5  ;;  %1633 = vmatmul.msk.f32.gmra.mxu3 %vm333_vm1, %v935_v5  ;;  %v946_v10 = vrot.slane %v2068_v31, 3 }
 0x102   : > { %v939_v16 = vsel %vm918_vm3, %v936_v7, %v938_v37  ;;  %v941_v5 = vsel %vm918_vm3, %v938_v37, %v940_v30 }
 0x104   : > { %v574_v11 = vpop.f32.mrf.mxu2  ;;  %v639_v20 = vpop.f32.mrf.mxu3 }
 0x105   : > { %v2627_v4 = vadd.f32 %v639_v20, %v574_v11  ;;  %v2629_v6 = vpop.f32.mrf.mxu1 }
 0x108   : > { %1602 = vmatmul.msk.f32.gmra.mxu1 %vm333_vm1, %v2415_v39  ;;  %v1205_v39 = vld [vmem:[#allocation2 + $0x18] sm:$0xff]  ;;  %v2649_v51 = vpop.f32.mrf.mxu0 }
 0x109   : > { %1618 = vmatmul.msk.f32.gmra.mxu2 %vm333_vm1, %v937_v42  ;;  %1634 = vmatmul.msk.f32.gmra.mxu3 %vm333_vm1, %v937_v42  ;;  %v943_v42 = vsel %vm918_vm3, %v940_v30, %v942_v52  ;;  %v945_v30 = vsel %vm918_vm3, %v942_v52, %v944_v9  ;;  %v947_v52 = vsel %vm918_vm3, %v944_v9, %v946_v10 }
 0x10a   : > { %1230 = vmatpush.msra.mxu0 %v1205_v39  ;;  %v1202_v39 = vld [vmem:[#allocation2] sm:$0xff] }
 0x10c   : > { %v577_v40 = vpop.f32.mrf.mxu2  ;;  %v642_v14 = vpop.f32.mrf.mxu3 }
 0x10d   : > { %v2639_v28 = vadd.f32 %v642_v14, %v577_v40  ;;  %v2641_v17 = vpop.f32.mrf.mxu1 }
 0x110   : > { %1603 = vmatmul.msk.f32.gmra.mxu1 %vm333_vm1, %v2436_v44  ;;  %v1204_v44 = vld [vmem:[#allocation2 + $0x10] sm:$0xff]  ;;  %v2666_v37 = vpop.f32.mrf.mxu0 }
 0x111   : > { %1619 = vmatmul.msk.f32.gmra.mxu2 %vm333_vm1, %v939_v16  ;;  %1635 = vmatmul.msk.f32.gmra.mxu3 %vm333_vm1, %v939_v16 }
 0x112   : > { %1231 = vmatpush.msra.mxu0 %v1204_v44 }
 0x114   : > { %v580_v62 = vpop.f32.mrf.mxu2  ;;  %v645_v29 = vpop.f32.mrf.mxu3 }
 0x115   : > { %v2651_v0 = vadd.f32 %v645_v29, %v580_v62  ;;  %v2653_v12 = vpop.f32.mrf.mxu1 }
 0x118   : > { %1604 = vmatmul.msk.f32.gmra.mxu1 %vm333_vm1, %v2448_v48  ;;  %v1203_v48 = vld [vmem:[#allocation2 + $0x8] sm:$0xff] }
 0x119   : > { %1620 = vmatmul.msk.f32.gmra.mxu2 %vm333_vm1, %v941_v5  ;;  %1636 = vmatmul.msk.f32.gmra.mxu3 %vm333_vm1, %v941_v5 }
 0x11a   : > { %1232 = vmatpush.msra.mxu0 %v1203_v48 }
 0x11c   : > { %v583_v7 = vpop.f32.mrf.mxu2  ;;  %v648_v35 = vpop.f32.mrf.mxu3  ;;  %1233 = vmatpush.msra.mxu0 %v1202_v39 }
 0x11d   : > { %v2661_v11 = vadd.f32 %v648_v35, %v583_v7  ;;  %v2663_v20 = vpop.f32.mrf.mxu1 }
 0x120   : > { %1605 = vmatmul.msk.f32.gmra.mxu1 %vm333_vm1, %v2469_v55  ;;  %v757_v55 = vpop.f32.mrf.mxu0 }
 0x121   : > { %1621 = vmatmul.msk.f32.gmra.mxu2 %vm333_vm1, %v943_v42  ;;  %1637 = vmatmul.msk.f32.gmra.mxu3 %vm333_vm1, %v943_v42 }
 0x124   : > { %v586_v8 = vpop.f32.mrf.mxu2  ;;  %v651_v40 = vpop.f32.mrf.mxu3 }
 0x125   : > { %v2673_v14 = vadd.f32 %v651_v40, %v586_v8  ;;  %v2675_v16 = vpop.f32.mrf.mxu1 }
 0x128   : > { %1606 = vmatmul.msk.f32.gmra.mxu1 %vm333_vm1, %v2483_v46  ;;  %v948_v46 = vrot.slane %v2134_v53, 3  ;;  %v760_v7 = vpop.f32.mrf.mxu0 }
 0x129   : > { %1622 = vmatmul.msk.f32.gmra.mxu2 %vm333_vm1, %v945_v30  ;;  %1638 = vmatmul.msk.f32.gmra.mxu3 %vm333_vm1, %v945_v30 }
 0x12a   : > { %v949_v8 = vsel %vm918_vm3, %v946_v10, %v948_v46 }
 0x12c   : > { %v589_v62 = vpop.f32.mrf.mxu2  ;;  %v654_v29 = vpop.f32.mrf.mxu3 }
 0x12d   : > { %v2683_v5 = vadd.f32 %v654_v29, %v589_v62  ;;  %v2685_v44 = vpop.f32.mrf.mxu1 }
 0x130   : > { %1607 = vmatmul.msk.f32.gmra.mxu1 %vm333_vm1, %v2501_v26  ;;  %v950_v26 = vrot.slane %v2197_v21, 3  ;;  %v763_v40 = vpop.f32.mrf.mxu0 }
 0x131   : > { %1623 = vmatmul.msk.f32.gmra.mxu2 %vm333_vm1, %v947_v52  ;;  %1639 = vmatmul.msk.f32.gmra.mxu3 %vm333_vm1, %v947_v52  ;;  %v481_v52 = vadd.f32 %v2547_v47, %v2622_v45 }
 0x132   : > { %v951_v62 = vsel %vm918_vm3, %v948_v46, %v950_v26 }
 0x134   : > { %v592_v35 = vpop.f32.mrf.mxu2  ;;  %v657_v31 = vpop.f32.mrf.mxu3 }
 0x135   : > { %v2693_v42 = vadd.f32 %v657_v31, %v592_v35  ;;  %v2695_v48 = vpop.f32.mrf.mxu1  ;;  %v805_v31 = vadd.f32 %v757_v55, %v481_v52  ;;  %v487_v52 = vadd.f32 %v2567_v58, %v2649_v51 }
 0x138   : > { %1608 = vmatmul.msk.f32.gmra.mxu1 %vm333_vm1, %v2519_v49  ;;  %v766_v35 = vpop.f32.mrf.mxu0 }
 0x139   : > { %1624 = vmatmul.msk.f32.gmra.mxu2 %vm333_vm1, %v949_v8  ;;  %1640 = vmatmul.msk.f32.gmra.mxu3 %vm333_vm1, %v949_v8 }
 0x13c   : > { %v595_v9 = vpop.f32.mrf.mxu2  ;;  %v660_v53 = vpop.f32.mrf.mxu3 }
 0x13d   : > { %v2703_v30 = vadd.f32 %v660_v53, %v595_v9  ;;  %v2705_v39 = vpop.f32.mrf.mxu1 }
 0x13e   : > { %2831 = vst [vmem:[#allocation10_spill] sm:$0xff] %v2705_v39 }
 0x13f   : > { %2830 = vst [vmem:[#allocation9_spill] sm:$0xff] %v2703_v30 }
 0x140   : > { %1609 = vmatmul.msk.f32.gmra.mxu1 %vm333_vm1, %v2537_v18 }
 0x141   : > { %1625 = vmatmul.msk.f32.gmra.mxu2 %vm333_vm1, %v951_v62  ;;  %1641 = vmatmul.msk.f32.gmra.mxu3 %vm333_vm1, %v951_v62  ;;  %v484_v62 = vadd.f32 %v2557_v15, %v2637_v25  ;;  %v807_v15 = vadd.f32 %v763_v40, %v487_v52 }
 0x144   : > { %v598_v49 = vpop.f32.mrf.mxu2  ;;  %v663_v10 = vpop.f32.mrf.mxu3 }
 0x145   : > { %v2712_v29 = vadd.f32 %v663_v10, %v598_v49  ;;  %v846_v21 = vpop.f32.mrf.mxu1  ;;  %v769_v49 = vpop.f32.mrf.mxu0 }
 0x146   : > { %v894_v8 = vadd.f32 %v846_v21, %v2555_v43 }
 0x147   : > { %2832 = vst [vmem:[#allocation11_spill] sm:$0xff] %v2712_v29  ;;  %v806_v29 = vadd.f32 %v760_v7, %v484_v62 }
 0x14c   : > { %v1001_v46 = vpop.f32.mrf.mxu2  ;;  %v1090_v26 = vpop.f32.mrf.mxu3 }
 0x14d   : > { %v1049_v9 = vadd.f32 %v1001_v46, %v805_v31  ;;  %v1138_v18 = vadd.f32 %v1090_v26, %v894_v8  ;;  %v849_v53 = vpop.f32.mrf.mxu1  ;;  %v772_v25 = vpop.f32.mrf.mxu0 }
 0x14e   : > { %v895_v30 = vadd.f32 %v849_v53, %v2565_v54 }
 0x14f   : > { %v1154_v39 = vmul.f32 %v1049_v9, %v1049_v9  ;;  %v1170_v38 = vmul.f32 %v1138_v18, %v1138_v18 }
 0x151   : > { %v1186_v10 = vadd.f32 %v1170_v38, %v1154_v39 }
 0x153   : > { %1234 = vmatmul.f32.vlgmr.msra.gmra.mxu0 %v1186_v10 }
 0x154   : > { %v1004_v47 = vpop.f32.mrf.mxu2  ;;  %v1093_v45 = vpop.f32.mrf.mxu3 }
 0x155   : > { %v1050_v55 = vadd.f32 %v1004_v47, %v806_v29  ;;  %v1139_v43 = vadd.f32 %v1093_v45, %v895_v30  ;;  %v852_v21 = vpop.f32.mrf.mxu1  ;;  %v490_v30 = vadd.f32 %v2577_v32, %v2666_v37  ;;  %v775_v10 = vpop.f32.mrf.mxu0 }
 0x156   : > { %v896_v26 = vadd.f32 %v852_v21, %v2575_v23 }
 0x157   : > { %v1155_v31 = vmul.f32 %v1050_v55, %v1050_v55  ;;  %v1171_v8 = vmul.f32 %v1139_v43, %v1139_v43  ;;  %v808_v58 = vadd.f32 %v766_v35, %v490_v30  ;;  %v493_v55 = vadd.f32 %v2587_v19, %v2473_v56 }
 0x159   : > { %v1187_v46 = vadd.f32 %v1171_v8, %v1155_v31  ;;  %v809_v32 = vadd.f32 %v769_v49, %v493_v55 }
 0x15b   : > { %1237 = vmatmul.f32.gmra.mxu0 %v1187_v46 }
 0x15c   : > { %v1007_v38 = vpop.f32.mrf.mxu2  ;;  %v1096_v7 = vpop.f32.mrf.mxu3 }
 0x15d   : > { %v1051_v54 = vadd.f32 %v1007_v38, %v807_v15  ;;  %v1140_v39 = vadd.f32 %v1096_v7, %v896_v26  ;;  %v855_v9 = vpop.f32.mrf.mxu1  ;;  %v496_v15 = vadd.f32 %v2597_v13, %v2491_v60  ;;  %v778_v26 = vpop.f32.mrf.mxu0 }
 0x15e   : > { %v897_v51 = vadd.f32 %v855_v9, %v2585_v41 }
 0x15f   : > { %v1156_v29 = vmul.f32 %v1051_v54, %v1051_v54  ;;  %v1172_v18 = vmul.f32 %v1140_v39, %v1140_v39  ;;  %v810_v56 = vadd.f32 %v772_v25, %v496_v15 }
 0x161   : > { %v1188_v53 = vadd.f32 %v1172_v18, %v1156_v29  ;;  %v499_v29 = vadd.f32 %v2607_v61, %v2509_v3 }
 0x163   : > { %1240 = vmatmul.f32.gmra.mxu0 %v1188_v53  ;;  %v811_v13 = vadd.f32 %v775_v10, %v499_v29  ;;  %v511_v29 = vadd.f32 %v2653_v12, %v2523_v24 }
 0x164   : > { %v1010_v40 = vpop.f32.mrf.mxu2  ;;  %v1099_v62 = vpop.f32.mrf.mxu3 }
 0x165   : > { %v1052_v23 = vadd.f32 %v1010_v40, %v808_v58  ;;  %v1141_v47 = vadd.f32 %v1099_v62, %v897_v51  ;;  %v858_v45 = vpop.f32.mrf.mxu1  ;;  %v781_v58 = vpop.f32.mrf.mxu0 }
 0x166   : > { %v898_v37 = vadd.f32 %v858_v45, %v2595_v50 }
 0x167   : > { %v1157_v43 = vmul.f32 %v1052_v23, %v1052_v23  ;;  %v1173_v21 = vmul.f32 %v1141_v47, %v1141_v47  ;;  %v502_v47 = vadd.f32 %v2617_v57, %v2527_v27 }
 0x169   : > { %v1189_v52 = vadd.f32 %v1173_v21, %v1157_v43  ;;  %v812_v3 = vadd.f32 %v778_v26, %v502_v47 }
 0x16b   : > { %1243 = vmatmul.f32.gmra.mxu0 %v1189_v52 }
 0x16c   : > { %v1013_v35 = vpop.f32.mrf.mxu2  ;;  %v1102_v31 = vpop.f32.mrf.mxu3 }
 0x16d   : > { %v1053_v41 = vadd.f32 %v1013_v35, %v809_v32  ;;  %v1142_v8 = vadd.f32 %v1102_v31, %v898_v37  ;;  %v861_v46 = vpop.f32.mrf.mxu1  ;;  %v784_v61 = vpop.f32.mrf.mxu0  ;;  %v505_v35 = vadd.f32 %v2629_v6, %v2487_v59 }
 0x16e   : > { %v899_v19 = vadd.f32 %v861_v46, %v2605_v63 }
 0x16f   : > { %v1158_v38 = vmul.f32 %v1053_v41, %v1053_v41  ;;  %v1174_v7 = vmul.f32 %v1142_v8, %v1142_v8  ;;  %v813_v27 = vadd.f32 %v781_v58, %v505_v35 }
 0x171   : > { %v1190_v54 = vadd.f32 %v1174_v7, %v1158_v38 }
 0x173   : > { %1246 = vmatmul.f32.gmra.mxu0 %v1190_v54  ;;  %v508_v54 = vadd.f32 %v2641_v17, %v2505_v1 }
 0x174   : > { %v1016_v49 = vpop.f32.mrf.mxu2  ;;  %v1105_v39 = vpop.f32.mrf.mxu3 }
 0x175   : > { %v1054_v50 = vadd.f32 %v1016_v49, %v810_v56  ;;  %v1143_v9 = vadd.f32 %v1105_v39, %v899_v19  ;;  %v864_v30 = vpop.f32.mrf.mxu1  ;;  %v787_v26 = vpop.f32.mrf.mxu0  ;;  %v814_v59 = vadd.f32 %v784_v61, %v508_v54  ;;  %v523_v54 = vadd.f32 %v2695_v48, %v2525_v22  ;;  %v2836_v48 = vld [vmem:[#allocation11_spill] sm:$0xff] }
 0x176   : > { %v900_v51 = vadd.f32 %v864_v30, %v2615_v34  ;;  %v815_v1 = vadd.f32 %v787_v26, %v511_v29 }
 0x177   : > { %v1159_v18 = vmul.f32 %v1054_v50, %v1054_v50  ;;  %v1175_v53 = vmul.f32 %v1143_v9, %v1143_v9 }
 0x179   : > { %v1191_v60 = vadd.f32 %v1175_v53, %v1159_v18 }
 0x17b   : > { %1249 = vmatmul.f32.gmra.mxu0 %v1191_v60 }
 0x17c   : > { %v1019_v25 = vpop.f32.mrf.mxu2  ;;  %v1108_v40 = vpop.f32.mrf.mxu3 }
 0x17d   : > { %v1055_v63 = vadd.f32 %v1019_v25, %v811_v13  ;;  %v1144_v62 = vadd.f32 %v1108_v40, %v900_v51  ;;  %v867_v23 = vpop.f32.mrf.mxu1  ;;  %v790_v18 = vpop.f32.mrf.mxu0 }
 0x17e   : > { %v901_v21 = vadd.f32 %v867_v23, %v2627_v4 }
 0x17f   : > { %v1160_v45 = vmul.f32 %v1055_v63, %v1055_v63  ;;  %v1176_v55 = vmul.f32 %v1144_v62, %v1144_v62  ;;  %v514_v63 = vadd.f32 %v2663_v20, %v2543_v36 }
 0x181   : > { %v1192_v43 = vadd.f32 %v1176_v55, %v1160_v45  ;;  %v816_v12 = vadd.f32 %v790_v18, %v514_v63 }
 0x183   : > { %1252 = vmatmul.f32.gmra.mxu0 %v1192_v43 }
 0x184   : > { %v1022_v10 = vpop.f32.mrf.mxu2  ;;  %v1111_v52 = vpop.f32.mrf.mxu3 }
 0x185   : > { %v1056_v34 = vadd.f32 %v1022_v10, %v812_v3  ;;  %v1145_v32 = vadd.f32 %v1111_v52, %v901_v21  ;;  %v870_v37 = vpop.f32.mrf.mxu1  ;;  %v793_v47 = vpop.f32.mrf.mxu0  ;;  %v517_v21 = vadd.f32 %v2675_v16, %v2489_v33 }
 0x186   : > { %v902_v57 = vadd.f32 %v870_v37, %v2639_v28 }
 0x187   : > { %v1161_v31 = vmul.f32 %v1056_v34, %v1056_v34  ;;  %v1177_v41 = vmul.f32 %v1145_v32, %v1145_v32  ;;  %v817_v36 = vadd.f32 %v793_v47, %v517_v21 }
 0x189   : > { %v1193_v8 = vadd.f32 %v1177_v41, %v1161_v31 }
 0x18b   : > { %1255 = vmatmul.f32.gmra.mxu0 %v1193_v8  ;;  %v520_v8 = vadd.f32 %v2685_v44, %v2507_v2  ;;  %v2833_v44 = vld [vmem:[#allocation9_spill] sm:$0xff] }
 0x18c   : > { %v1025_v46 = vpop.f32.mrf.mxu2  ;;  %v1114_v15 = vpop.f32.mrf.mxu3 }
 0x18d   : > { %v1057_v4 = vadd.f32 %v1025_v46, %v813_v27  ;;  %v1146_v38 = vadd.f32 %v1114_v15, %v902_v57  ;;  %v873_v7 = vpop.f32.mrf.mxu1  ;;  %v796_v20 = vpop.f32.mrf.mxu0 }
 0x18e   : > { %v903_v6 = vadd.f32 %v873_v7, %v2651_v0  ;;  %v818_v33 = vadd.f32 %v796_v20, %v520_v8 }
 0x18f   : > { %v1162_v56 = vmul.f32 %v1057_v4, %v1057_v4  ;;  %v1178_v19 = vmul.f32 %v1146_v38, %v1146_v38 }
 0x191   : > { %v1194_v49 = vadd.f32 %v1178_v19, %v1162_v56 }
 0x193   : > { %1258 = vmatmul.f32.gmra.mxu0 %v1194_v49 }
 0x194   : > { %v1028_v39 = vpop.f32.mrf.mxu2  ;;  %v1117_v50 = vpop.f32.mrf.mxu3 }
 0x195   : > { %v1058_v28 = vadd.f32 %v1028_v39, %v814_v59  ;;  %v1147_v9 = vadd.f32 %v1117_v50, %v903_v6  ;;  %v876_v30 = vpop.f32.mrf.mxu1  ;;  %v799_v38 = vpop.f32.mrf.mxu0 }
 0x196   : > { %v904_v17 = vadd.f32 %v876_v30, %v2661_v11  ;;  %v819_v2 = vadd.f32 %v799_v38, %v523_v54 }
 0x197   : > { %v1163_v53 = vmul.f32 %v1058_v28, %v1058_v28  ;;  %v1179_v58 = vmul.f32 %v1147_v9, %v1147_v9  ;;  %v2834_v28 = vld [vmem:[#allocation8_spill] sm:$0xff]  ;;  %v2835_v9 = vld [vmem:[#allocation10_spill] sm:$0xff] }
 0x198   : > { %v526_v30 = vadd.f32 %v2835_v9, %v2834_v28 }
 0x199   : > { %v1195_v60 = vadd.f32 %v1179_v58, %v1163_v53 }
 0x19b   : > { %1261 = vmatmul.f32.gmra.mxu0 %v1195_v60 }
 0x19c   : > { %v1031_v13 = vpop.f32.mrf.mxu2  ;;  %v1120_v51 = vpop.f32.mrf.mxu3 }
 0x19d   : > { %v1059_v0 = vadd.f32 %v1031_v13, %v815_v1  ;;  %v1148_v25 = vadd.f32 %v1120_v51, %v904_v17  ;;  %v879_v40 = vpop.f32.mrf.mxu1  ;;  %v802_v53 = vpop.f32.mrf.mxu0 }
 0x19e   : > { %v905_v45 = vadd.f32 %v879_v40, %v2673_v14  ;;  %v820_v22 = vadd.f32 %v802_v53, %v526_v30 }
 0x19f   : > { %v1164_v62 = vmul.f32 %v1059_v0, %v1059_v0  ;;  %v1180_v23 = vmul.f32 %v1148_v25, %v1148_v25 }
 0x1a1   : > { %v1196_v24 = vadd.f32 %v1180_v23, %v1164_v62 }
 0x1a3   : > { %1264 = vmatmul.f32.gmra.mxu0 %v1196_v24 }
 0x1a4   : > { %v1034_v55 = vpop.f32.mrf.mxu2  ;;  %v1123_v43 = vpop.f32.mrf.mxu3 }
 0x1a5   : > { %v1060_v11 = vadd.f32 %v1034_v55, %v816_v12  ;;  %v1149_v3 = vadd.f32 %v1123_v43, %v905_v45  ;;  %v882_v61 = vpop.f32.mrf.mxu1 }
 0x1a6   : > { %v906_v32 = vadd.f32 %v882_v61, %v2683_v5 }
 0x1a7   : > { %v1165_v10 = vmul.f32 %v1060_v11, %v1060_v11  ;;  %v1181_v52 = vmul.f32 %v1149_v3, %v1149_v3 }
 0x1a9   : > { %v1197_v34 = vadd.f32 %v1181_v52, %v1165_v10 }
 0x1ab   : > { %1267 = vmatmul.f32.gmra.mxu0 %v1197_v34 }
 0x1ac   : > { %v1037_v37 = vpop.f32.mrf.mxu2  ;;  %v1126_v35 = vpop.f32.mrf.mxu3 }
 0x1ad   : > { %v1061_v14 = vadd.f32 %v1037_v37, %v817_v36  ;;  %v1150_v31 = vadd.f32 %v1126_v35, %v906_v32  ;;  %v885_v41 = vpop.f32.mrf.mxu1 }
 0x1ae   : > { %v907_v16 = vadd.f32 %v885_v41, %v2693_v42 }
 0x1af   : > { %v1166_v27 = vmul.f32 %v1061_v14, %v1061_v14  ;;  %v1182_v57 = vmul.f32 %v1150_v31, %v1150_v31 }
 0x1b1   : > { %v1198_v46 = vadd.f32 %v1182_v57, %v1166_v27 }
 0x1b3   : > { %1270 = vmatmul.f32.gmra.mxu0 %v1198_v46 }
 0x1b4   : > { %v1040_v15 = vpop.f32.mrf.mxu2  ;;  %v1129_v26 = vpop.f32.mrf.mxu3 }
 0x1b5   : > { %v1062_v4 = vadd.f32 %v1040_v15, %v818_v33  ;;  %v1151_v5 = vadd.f32 %v1129_v26, %v907_v16  ;;  %v888_v7 = vpop.f32.mrf.mxu1 }
 0x1b6   : > { %v908_v59 = vadd.f32 %v888_v7, %v2833_v44 }
 0x1b7   : > { %v1167_v56 = vmul.f32 %v1062_v4, %v1062_v4  ;;  %v1183_v19 = vmul.f32 %v1151_v5, %v1151_v5 }
 0x1b9   : > { %v1199_v49 = vadd.f32 %v1183_v19, %v1167_v56 }
 0x1bb   : > { %1273 = vmatmul.f32.gmra.mxu0 %v1199_v49 }
 0x1bc   : > { %v1043_v6 = vpop.f32.mrf.mxu2  ;;  %v1132_v39 = vpop.f32.mrf.mxu3 }
 0x1bd   : > { %v1063_v42 = vadd.f32 %v1043_v6, %v819_v2  ;;  %v1152_v50 = vadd.f32 %v1132_v39, %v908_v59  ;;  %v891_v58 = vpop.f32.mrf.mxu1 }
 0x1be   : > { %v909_v1 = vadd.f32 %v891_v58, %v2836_v48 }
 0x1bf   : > { %v1168_v29 = vmul.f32 %v1063_v42, %v1063_v42  ;;  %v1184_v18 = vmul.f32 %v1152_v50, %v1152_v50 }
 0x1c1   : > { %v1200_v60 = vadd.f32 %v1184_v18, %v1168_v29 }
 0x1c3   : > { %1276 = vmatmul.f32.gmra.mxu0 %v1200_v60 }
 0x1c4   : > { %v1046_v17 = vpop.f32.mrf.mxu2  ;;  %v1135_v13 = vpop.f32.mrf.mxu3 }
 0x1c5   : > { %v1064_v51 = vadd.f32 %v1046_v17, %v820_v22  ;;  %v1153_v0 = vadd.f32 %v1135_v13, %v909_v1 }
 0x1c7   : > { %v1169_v25 = vmul.f32 %v1064_v51, %v1064_v51  ;;  %v1185_v40 = vmul.f32 %v1153_v0, %v1153_v0 }
 0x1c9   : > { %v1201_v63 = vadd.f32 %v1185_v40, %v1169_v25 }
 0x1cb   : > { %1279 = vmatmul.f32.gmra.mxu0 %v1201_v63 }
 0x1d0   : > { %v1235_v62 = vpop.f32.mrf.mxu0 }
 0x1d1   : > { %v1283_v23 = vmax.f32 %v1235_v62, 1e-10 }
 0x1d3   : > { %1743 = vlog2.f32 %v1283_v23 }
 0x1d8   : > { %v1238_v47 = vpop.f32.mrf.mxu0 }
 0x1d9   : > { %v1744_v24 = vpop.eup %1743  ;;  %v1284_v12 = vmax.f32 %v1238_v47, 1e-10 }
 0x1da   : > { %v1300_v45 = vmul.f32 0.6931472, %v1744_v24 }
 0x1db   : > { %1745 = vlog2.f32 %v1284_v12 }
 0x1dc   : > { %v1331_v55 = vmul.f32 4.3429446, %v1300_v45 }
 0x1de   : > { %1347 = vxpose.xlu0.b32.start [1/16] %v1331_v55, 128 }
 0x1e0   : > { %v1241_v43 = vpop.f32.mrf.mxu0 }
 0x1e1   : > { %v1746_v11 = vpop.eup %1745  ;;  %v1285_v3 = vmax.f32 %v1241_v43, 1e-10 }
 0x1e2   : > { %v1302_v61 = vmul.f32 0.6931472, %v1746_v11 }
 0x1e3   : > { %1747 = vlog2.f32 %v1285_v3 }
 0x1e4   : > { %v1332_v21 = vmul.f32 4.3429446, %v1302_v61 }
 0x1e6   : > { %1348 = vxpose.xlu0.b32.cont [2/16] %v1332_v21, 128 }
 0x1e8   : > { %v1244_v10 = vpop.f32.mrf.mxu0 }
 0x1e9   : > { %v1748_v52 = vpop.eup %1747  ;;  %v1286_v34 = vmax.f32 %v1244_v10, 1e-10 }
 0x1ea   : > { %v1304_v36 = vmul.f32 0.6931472, %v1748_v52 }
 0x1eb   : > { %1749 = vlog2.f32 %v1286_v34 }
 0x1ec   : > { %v1333_v20 = vmul.f32 4.3429446, %v1304_v36 }
 0x1ee   : > { %1349 = vxpose.xlu0.b32.cont [3/16] %v1333_v20, 128 }
 0x1f0   : > { %v1247_v32 = vpop.f32.mrf.mxu0 }
 0x1f1   : > { %v1750_v37 = vpop.eup %1749  ;;  %v1287_v35 = vmax.f32 %v1247_v32, 1e-10 }
 0x1f2   : > { %v1306_v14 = vmul.f32 0.6931472, %v1750_v37 }
 0x1f3   : > { %1751 = vlog2.f32 %v1287_v35 }
 0x1f4   : > { %v1334_v31 = vmul.f32 4.3429446, %v1306_v14 }
 0x1f6   : > { %1350 = vxpose.xlu0.b32.cont [4/16] %v1334_v31, 128 }
 0x1f8   : > { %v1250_v41 = vpop.f32.mrf.mxu0 }
 0x1f9   : > { %v1752_v8 = vpop.eup %1751  ;;  %v1288_v27 = vmax.f32 %v1250_v41, 1e-10 }
 0x1fa   : > { %v1308_v57 = vmul.f32 0.6931472, %v1752_v8 }
 0x1fb   : > { %1753 = vlog2.f32 %v1288_v27 }
 0x1fc   : > { %v1335_v46 = vmul.f32 4.3429446, %v1308_v57 }
 0x1fe   : > { %1351 = vxpose.xlu0.b32.cont [5/16] %v1335_v46, 128 }
 0x200   : > { %v1253_v33 = vpop.f32.mrf.mxu0 }
 0x201   : > { %v1754_v16 = vpop.eup %1753  ;;  %v1289_v15 = vmax.f32 %v1253_v33, 1e-10 }
 0x202   : > { %v1310_v26 = vmul.f32 0.6931472, %v1754_v16 }
 0x203   : > { %1755 = vlog2.f32 %v1289_v15 }
 0x204   : > { %v1336_v4 = vmul.f32 4.3429446, %v1310_v26 }
 0x206   : > { %1352 = vxpose.xlu0.b32.cont [6/16] %v1336_v4, 128 }
 0x208   : > { %v1256_v5 = vpop.f32.mrf.mxu0 }
 0x209   : > { %v1756_v38 = vpop.eup %1755  ;;  %v1290_v7 = vmax.f32 %v1256_v5, 1e-10 }
 0x20a   : > { %v1312_v54 = vmul.f32 0.6931472, %v1756_v38 }
 0x20b   : > { %1757 = vlog2.f32 %v1290_v7 }
 0x20c   : > { %v1337_v56 = vmul.f32 4.3429446, %v1312_v54 }
 0x20e   : > { %1353 = vxpose.xlu0.b32.cont [7/16] %v1337_v56, 128 }
 0x210   : > { %v1259_v19 = vpop.f32.mrf.mxu0 }
 0x211   : > { %v1758_v49 = vpop.eup %1757  ;;  %v1291_v2 = vmax.f32 %v1259_v19, 1e-10 }
 0x212   : > { %v1314_v44 = vmul.f32 0.6931472, %v1758_v49 }
 0x213   : > { %1759 = vlog2.f32 %v1291_v2 }
 0x214   : > { %v1338_v59 = vmul.f32 4.3429446, %v1314_v44 }
 0x216   : > { %1354 = vxpose.xlu0.b32.cont [8/16] %v1338_v59, 128 }
 0x218   : > { %v1262_v6 = vpop.f32.mrf.mxu0 }
 0x219   : > { %v1760_v39 = vpop.eup %1759  ;;  %v1292_v42 = vmax.f32 %v1262_v6, 1e-10 }
 0x21a   : > { %v1316_v50 = vmul.f32 0.6931472, %v1760_v39 }
 0x21b   : > { %1761 = vlog2.f32 %v1292_v42 }
 0x21c   : > { %v1339_v28 = vmul.f32 4.3429446, %v1316_v50 }
 0x21e   : > { %1355 = vxpose.xlu0.b32.cont [9/16] %v1339_v28, 128 }
 0x220   : > { %v1265_v9 = vpop.f32.mrf.mxu0 }
 0x221   : > { %v1762_v30 = vpop.eup %1761  ;;  %v1293_v29 = vmax.f32 %v1265_v9, 1e-10 }
 0x222   : > { %v1318_v18 = vmul.f32 0.6931472, %v1762_v30 }
 0x223   : > { %1763 = vlog2.f32 %v1293_v29 }
 0x224   : > { %v1340_v53 = vmul.f32 4.3429446, %v1318_v18 }
 0x226   : > { %1356 = vxpose.xlu0.b32.cont [10/16] %v1340_v53, 128 }
 0x228   : > { %v1268_v58 = vpop.f32.mrf.mxu0 }
 0x229   : > { %v1764_v60 = vpop.eup %1763  ;;  %v1294_v22 = vmax.f32 %v1268_v58, 1e-10 }
 0x22a   : > { %v1320_v48 = vmul.f32 0.6931472, %v1764_v60 }
 0x22b   : > { %1765 = vlog2.f32 %v1294_v22 }
 0x22c   : > { %v1341_v1 = vmul.f32 4.3429446, %v1320_v48 }
 0x22e   : > { %1357 = vxpose.xlu0.b32.cont [11/16] %v1341_v1, 128 }
 0x230   : > { %v1271_v17 = vpop.f32.mrf.mxu0 }
 0x231   : > { %v1766_v13 = vpop.eup %1765  ;;  %v1295_v51 = vmax.f32 %v1271_v17, 1e-10 }
 0x232   : > { %v1322_v0 = vmul.f32 0.6931472, %v1766_v13 }
 0x233   : > { %1767 = vlog2.f32 %v1295_v51 }
 0x234   : > { %v1342_v25 = vmul.f32 4.3429446, %v1322_v0 }
 0x236   : > { %1358 = vxpose.xlu0.b32.cont [12/16] %v1342_v25, 128 }
 0x238   : > { %v1274_v40 = vpop.f32.mrf.mxu0 }
 0x239   : > { %v1768_v63 = vpop.eup %1767  ;;  %v1296_v62 = vmax.f32 %v1274_v40, 1e-10 }
 0x23a   : > { %v1324_v23 = vmul.f32 0.6931472, %v1768_v63 }
 0x23b   : > { %1769 = vlog2.f32 %v1296_v62 }
 0x23c   : > { %v1343_v47 = vmul.f32 4.3429446, %v1324_v23 }
 0x23e   : > { %1359 = vxpose.xlu0.b32.cont [13/16] %v1343_v47, 128 }
 0x240   : > { %v1277_v24 = vpop.f32.mrf.mxu0 }
 0x241   : > { %v1770_v12 = vpop.eup %1769  ;;  %v1297_v45 = vmax.f32 %v1277_v24, 1e-10 }
 0x242   : > { %v1326_v55 = vmul.f32 0.6931472, %v1770_v12 }
 0x243   : > { %1771 = vlog2.f32 %v1297_v45 }
 0x244   : > { %v1344_v43 = vmul.f32 4.3429446, %v1326_v55 }
 0x246   : > { %1360 = vxpose.xlu0.b32.cont [14/16] %v1344_v43, 128 }
 0x248   : > { %v1280_v11 = vpop.f32.mrf.mxu0 }
 0x249   : > { %v1772_v3 = vpop.eup %1771  ;;  %v1298_v61 = vmax.f32 %v1280_v11, 1e-10 }
 0x24a   : > { %v1328_v21 = vmul.f32 0.6931472, %v1772_v3 }
 0x24b   : > { %1773 = vlog2.f32 %v1298_v61 }
 0x24c   : > { %v1345_v10 = vmul.f32 4.3429446, %v1328_v21 }
 0x24e   : > { %1361 = vxpose.xlu0.b32.cont [15/16] %v1345_v10, 128 }
 0x251   : > { %v1774_v52 = vpop.eup %1773 }
 0x252   : > { %v1330_v34 = vmul.f32 0.6931472, %v1774_v52 }
 0x254   : > { %v1346_v36 = vmul.f32 4.3429446, %v1330_v34 }
 0x256   : > { %1362 = vxpose.xlu0.b32.end [16/16] %v1346_v36, 128 }
 0x282   : > { %v1363_v20 = vpop.trf.xlu0 }
 0x283   : > { %1379 = vst [vmem:[%s2765_s5] sm:$0xff] %v1363_v20 }
 0x28a   : > { %v1364_v32 = vpop.trf.xlu0 }
 0x28b   : > { %1380 = vst [vmem:[%s2765_s5 + $0x8] sm:$0xff] %v1364_v32 }
 0x292   : > { %v1365_v37 = vpop.trf.xlu0 }
 0x293   : > { %1381 = vst [vmem:[%s2765_s5 + $0x10] sm:$0xff] %v1365_v37 }
 0x29a   : > { %v1366_v35 = vpop.trf.xlu0 }
 0x29b   : > { %1382 = vst [vmem:[%s2765_s5 + $0x18] sm:$0xff] %v1366_v35 }
 0x2a2   : > { %v1367_v14 = vpop.trf.xlu0 }
 0x2a3   : > { %1383 = vst [vmem:[%s2765_s5 + $0x20] sm:$0xff] %v1367_v14 }
 0x2aa   : > { %v1368_v31 = vpop.trf.xlu0 }
 0x2ab   : > { %1384 = vst [vmem:[%s2765_s5 + $0x28] sm:$0xff] %v1368_v31 }
 0x2b2   : > { %v1369_v41 = vpop.trf.xlu0 }
 0x2b3   : > { %1385 = vst [vmem:[%s2765_s5 + $0x30] sm:$0xff] %v1369_v41 }
 0x2ba   : > { %v1370_v8 = vpop.trf.xlu0 }
 0x2bb   : > { %1386 = vst [vmem:[%s2765_s5 + $0x38] sm:$0xff] %v1370_v8 }
 0x2c2   : > { %v1371_v27 = vpop.trf.xlu0 }
 0x2c3   : > { %1387 = vst [vmem:[%s2765_s5 + $0x40] sm:$0xff] %v1371_v27 }
 0x2ca   : > { %v1372_v57 = vpop.trf.xlu0 }
 0x2cb   : > { %1388 = vst [vmem:[%s2765_s5 + $0x48] sm:$0xff] %v1372_v57 }
 0x2d2   : > { %v1373_v46 = vpop.trf.xlu0 }
 0x2d3   : > { %1389 = vst [vmem:[%s2765_s5 + $0x50] sm:$0xff] %v1373_v46 }
 0x2da   : > { %v1374_v33 = vpop.trf.xlu0 }
 0x2db   : > { %1390 = vst [vmem:[%s2765_s5 + $0x58] sm:$0xff] %v1374_v33 }
 0x2e2   : > { %v1375_v16 = vpop.trf.xlu0 }
 0x2e3   : > { %1391 = vst [vmem:[%s2765_s5 + $0x60] sm:$0xff] %v1375_v16 }
 0x2ea   : > { %v1376_v15 = vpop.trf.xlu0 }
 0x2eb   : > { %1392 = vst [vmem:[%s2765_s5 + $0x68] sm:$0xff] %v1376_v15 }
 0x2f2   : > { %v1377_v26 = vpop.trf.xlu0 }
 0x2f3   : > { %1393 = vst [vmem:[%s2765_s5 + $0x70] sm:$0xff] %v1377_v26 }
 0x2fa   : > { %v1378_v4 = vpop.trf.xlu0 }
 0x2fb   : > { %1394 = vst [vmem:[%s2765_s5 + $0x78] sm:$0xff] %v1378_v4 }
 0x2fc   : > { %1832 = shalt.err (!%p1829_p9)
}
 0x2fd   : > { %s1892_s26 = smov 128   ;;  %s1893_s29 = smov 8  }
 0x2fe   : > { %1677 = dma.vmem_to_hbm [thread:$0]  (%p1959_p4), %s1410_s9, 2048, %s1412_s10, %s1396_s11, %s1892_s26, %s1892_s26, %s1893_s29  }
 0x2ff PF: > { %p1689_p10 = scmp.ge.s32.totalorder %s1887_s20, 2  ;;  %s1426_s5 = sand.u32 1, %s1867_s15  }
 0x300   : > { %s1427_s6 = scalar_lea.sflag [#allocation4], %s1426_s5 }
 0x301   : > { %p1684_p11 = pnand %p1689_p10, %p1966_p8 }
 0x303   : > { %p1685_p12 = pneg %p1684_p11 }
 0x305   : > { %1862 = dma.done.wait (%p1685_p12), %s1427_s6, 2048  }
 0x306   : > { %1864 = vsyncadd (%p1685_p12), %s1427_s6, 4294965248  ;;  %s18_s20 = sadd.s32 1, %s1887_s20   ;;  %s2837_s15 = smov %s1871_s16 }
 0x307   : > { %p15_p13 = scmp.ge.s32.totalorder %s18_s20, 4   ;;  %s2838_s16 = smov %s1875_s17 }
 0x308   : > { %s2839_s17 = smov %s1972_s28  ;;  %s2840_s18 = smov %s1883_s19 }
 0x309   : > { %s2841_s19 = smov %s2843_s23  ;;  %17 = sbr.rel (!%p15_p13) target bundleno = 5 (0x5), region = 76 }
 0x30e   :  { %1433 = vsyncpa [#allocation3], 1 }
 0x30f   :  { %1435 = vsyncpa [#allocation3 + $0x1], 1 }
 0x310   :  { %1436 = vsyncpa [#allocation4], 1 }
 0x311   :  { %1438 = vsyncpa [#allocation4 + $0x1], 1 }

</bundles_post_ra>
